<compile_context>
chip_gen: v7x
topology: tpu7x:2x2x1
jax: 0.10.0
libtpu: 0.0.40
codegen_flags: <defaults>
</compile_context>

<pallas_src>
import functools
import math

import jax
import jax.numpy as jnp
from jax.experimental import pallas as pl
from jax.experimental.pallas import tpu as pltpu

HID = 64                               # encoder_h_dim
IN_FEAT = 2                            # nn.LSTM(2, encoder_h_dim)
GATE_PAD = 128                         # each 64-wide gate left-justified in a 128-lane slot
MLP_DIMS = [HID, 72, 512, 256, 128]    # mlp_structure after inserting encoder_h_dim
MLP_PAD1 = 128                         # lane-dense padding of the 72-wide layer
ENC_TILE_B = 256                       # batch tile for the gridded encoder (>=128 v5e, >=256 v6e/v7x)
FUSED_MAX_B = 256                      # below this, one fully fused pallas_call is cheapest

_VMEM = pl.BlockSpec(memory_space=pltpu.MemorySpace.VMEM)


# ------------------------------ shared kernel math ---------------------------
def _lstm_recurrence(x_ref, wih, whh, bias, B, T):
    """LSTM over x_ref (T, B, 2). Returns h (B, GATE_PAD) f32 with pad lanes == 0.

    Pad-lane invariant: gate pre-activations on lanes [HID:128] of each gate slot
    are exactly 0 (zero-padded weights/bias), so c_pad = sig(0)*0 + sig(0)*tanh(0) = 0
    and h_pad = sig(0)*tanh(0) = 0 for every step.
    """
    GP = GATE_PAD

    def step(x_t, h, c):
        # Input projection as two VPU rank-1 updates (no K=2 MXU matmul).
        xp = x_t[:, 0:1] * wih[0:1, :] + x_t[:, 1:2] * wih[1:2, :] + bias   # (B, 4*GP)
        # Serial-path matmul with K = HID (64), not the padded 128.
        # TODO(synk): on v5e, pin the four (64,128) gate tiles of W_hh in the MXU
        # weight registers across the recurrence via pltpu.matmul_push_rhs/acc_lhs/pop.
        gates = xp + jnp.dot(h[:, :HID], whh, preferred_element_type=jnp.float32)
        # PyTorch gate order i, f, g, o; each slice is exactly one 128-lane vreg.
        i_g = jax.nn.sigmoid(gates[:, 0 * GP:1 * GP])
        f_g = jax.nn.sigmoid(gates[:, 1 * GP:2 * GP])
        g_g = jnp.tanh(gates[:, 2 * GP:3 * GP])
        o_g = jax.nn.sigmoid(gates[:, 3 * GP:4 * GP])
        c = f_g * c + i_g * g_g
        h = o_g * jnp.tanh(c)
        return h, c

    h = jnp.zeros((B, GP), jnp.float32)
    c = jnp.zeros((B, GP), jnp.float32)
    if T <= 16:
        for t in range(T):                      # small T: fully static unroll
            h, c = step(x_ref[t], h, c)
    else:
        # Larger T: bound code size / live ranges while keeping LLO visibility.
        def body(t, carry):
            return step(x_ref[t], *carry)
        h, c = jax.lax.fori_loop(0, T, body, (h, c), unroll=2)
    return h


def _classifier(h, w1, b1, w2, b2, w3, b3, w4, b4, w5, b5):
    """Spectral-norm MLP head. Weight refs are bf16 (halved HBM DMA); upcast in-kernel
    so all matmul accumulation stays f32."""
    def bn(v):  # BatchNorm1d, training-mode batch statistics, gamma=1, beta=0
        mean = jnp.mean(v, axis=0, keepdims=True)
        var = jnp.mean(jnp.square(v - mean), axis=0, keepdims=True)
        return (v - mean) * jax.lax.rsqrt(var + 1e-5)

    def lin(v, w_ref, b_ref):
        return jnp.dot(v, w_ref[...].astype(jnp.float32),
                       preferred_element_type=jnp.float32) + b_ref[...]

    # h is (B, 128) with pad lanes exactly 0; W1 is row/col zero-padded, so this is
    # numerically identical to the unpadded 64 -> 72 layer.
    y = bn(jnp.maximum(lin(h, w1, b1), 0.0))   # 64  -> 72 (lane-padded to 128), ReLU, BN
    y = bn(jnp.maximum(lin(y, w2, b2), 0.0))   # 72(p128) -> 512, ReLU, BN
    y = bn(jnp.maximum(lin(y, w3, b3), 0.0))   # 512 -> 256, ReLU, BN
    y = jnp.maximum(lin(y, w4, b4), 0.0)       # 256 -> 128, ReLU (no BN: last mlp dim)
    # Final 128 -> 1 on VPU multiply + XLU lane reduce (skip an N=1 MXU push/drain).
    # TODO(synk): callers wanting an unmasked lane-dense store could take (B, 128)
    # and slice column 0 outside; kept (B, 1) to match the module's output shape.
    w5_row = w5[...].astype(jnp.float32)                       # (1, 128)
    return jnp.sum(y * w5_row, axis=-1, keepdims=True) + b5[...]


# ---------------------------------- kernels ----------------------------------
def _fused_kernel(x_ref, wih_ref, whh_ref, b_ref,
                  w1, b1, w2, b2, w3, b3, w4, b4, w5, b5,
                  out_ref, *, T, B):
    wih = wih_ref[...].astype(jnp.float32)      # (2, 4*GP)
    whh = whh_ref[...].astype(jnp.float32)      # (HID, 4*GP)
    bias = b_ref[...]                           # (1, 4*GP) f32
    h = _lstm_recurrence(x_ref, wih, whh, bias, B, T)
    out_ref[...] = _classifier(h, w1, b1, w2, b2, w3, b3, w4, b4, w5, b5)


def _encoder_kernel(x_ref, wih_ref, whh_ref, b_ref, h_ref, *, T, TB):
    wih = wih_ref[...].astype(jnp.float32)
    whh = whh_ref[...].astype(jnp.float32)
    bias = b_ref[...]
    h_ref[...] = _lstm_recurrence(x_ref, wih, whh, bias, TB, T)


def _classifier_kernel(h_ref, w1, b1, w2, b2, w3, b3, w4, b4, w5, b5, out_ref):
    out_ref[...] = _classifier(h_ref[...], w1, b1, w2, b2, w3, b3, w4, b4, w5, b5)


# ------------------------------ cost estimation ------------------------------
def _weight_bytes(*arrays):
    return sum(int(a.size) * a.dtype.itemsize for a in arrays)


def _lstm_cost_nums(B, T):
    flops = 2 * B * T * (HID + IN_FEAT) * 4 * GATE_PAD
    trans = B * T * 5 * GATE_PAD
    return flops, trans


def _mlp_cost_nums(B):
    dims = [GATE_PAD, MLP_PAD1, 512, 256, 128, 1]
    flops = 2 * B * sum(a * b for a, b in zip(dims[:-1], dims[1:]))
    trans = B * (MLP_PAD1 + 512 + 256)
    return flops, trans


# ------------------------------- forward paths -------------------------------
def _fused_forward(traj, wih, whh, b, mlp_flat, *, T, B):
    """Single fully fused pallas_call (LSTM + classifier). Best for small batches."""
    args = (traj, wih, whh, b) + tuple(mlp_flat)
    wbytes = _weight_bytes(wih, whh, b, *mlp_flat)
    lf, lt = _lstm_cost_nums(B, T)
    mf, mt = _mlp_cost_nums(B)
    cost = pl.CostEstimate(
        flops=lf + mf, transcendentals=lt + mt,
        bytes_accessed=wbytes + B * T * IN_FEAT * 4 + B * 4)
    return pl.pallas_call(
        functools.partial(_fused_kernel, T=T, B=B),
        out_shape=jax.ShapeDtypeStruct((B, 1), jnp.float32),
        in_specs=[_VMEM] * len(args),
        out_specs=_VMEM,
        cost_estimate=cost,
    )(*args)


def _tiled_forward(traj, wih, whh, b, mlp_flat, *, T, B):
    """Large batch: batch-tiled 'parallel' encoder grid (megacore split on v7x),
    then one full-batch classifier call so BatchNorm stats cover the whole batch."""
    tb = ENC_TILE_B
    n_tiles = pl.cdiv(B, tb)
    Bp = n_tiles * tb
    if Bp != B:
        traj = jnp.pad(traj, ((0, 0), (0, Bp - B), (0, 0)))

    ef, et = _lstm_cost_nums(Bp, T)
    enc_cost = pl.CostEstimate(
        flops=ef, transcendentals=et,
        bytes_accessed=_weight_bytes(wih, whh, b) + Bp * T * IN_FEAT * 4 + Bp * GATE_PAD * 4)
    # Per-tile VMEM: x tile (T, 256, 2) f32 ~16 KiB, h tile (256, 128) f32 128 KiB,
    # weights ~70 KiB -> comfortably under the default scoped VMEM limit on v5e/v6e/v7x.
    h = pl.pallas_call(
        functools.partial(_encoder_kernel, T=T, TB=tb),
        out_shape=jax.ShapeDtypeStruct((Bp, GATE_PAD), jnp.float32),
        grid=(n_tiles,),
        in_specs=[pl.BlockSpec((T, tb, IN_FEAT), lambda i: (0, i, 0)),
                  pl.BlockSpec((IN_FEAT, 4 * GATE_PAD), lambda i: (0, 0)),
                  pl.BlockSpec((HID, 4 * GATE_PAD), lambda i: (0, 0)),
                  pl.BlockSpec((1, 4 * GATE_PAD), lambda i: (0, 0))],
        out_specs=pl.BlockSpec((tb, GATE_PAD), lambda i: (i, 0)),
        compiler_params=pltpu.CompilerParams(
            dimension_semantics=("parallel",)),      # both v7x TensorCores take tiles
        cost_estimate=enc_cost,
    )(traj, wih, whh, b)

    if Bp != B:
        h = h[:B]

    mf, mt = _mlp_cost_nums(B)
    cls_cost = pl.CostEstimate(
        flops=mf, transcendentals=mt,
        bytes_accessed=_weight_bytes(*mlp_flat) + B * GATE_PAD * 4 + B * 4)
    # BatchNorm needs FULL-batch statistics, so the classifier is not batch-tiled.
    # Activations are (B, 512) f32 (~2 KiB/row), fine in VMEM up to B of a few thousand.
    # TODO(synk): for very large B, add a two-pass (sum/sumsq) BN reduction across tiles.
    return pl.pallas_call(
        _classifier_kernel,
        out_shape=jax.ShapeDtypeStruct((B, 1), jnp.float32),
        in_specs=[_VMEM] * (1 + len(mlp_flat)),
        out_specs=_VMEM,
        cost_estimate=cls_cost,
    )(h, *mlp_flat)


@jax.jit
def trajectory_discriminator(traj, lstm_params, mlp_params):
    """traj: (seq_len, batch, 2) float32, time-major like nn.LSTM. Returns (batch, 1)."""
    T, B, _ = traj.shape
    flat = []
    for w, bb in mlp_params:
        flat.extend([w, bb])
    # Tip (per review): concatenate real+fake trajectories along the batch axis before
    # calling -- one bigger call amortizes the weight DMA / launch cost and fills the MXU.
    if B <= FUSED_MAX_B:
        return _fused_forward(traj, lstm_params["wih"], lstm_params["whh"],
                              lstm_params["b"], flat, T=T, B=B)
    return _tiled_forward(traj, lstm_params["wih"], lstm_params["whh"],
                          lstm_params["b"], flat, T=T, B=B)


# --------------------------- parameters / packing ----------------------------
def make_params(key):
    keys = iter(jax.random.split(key, 16))

    def uniform(kk, shape, bound):
        return jax.random.uniform(kk, shape, jnp.float32, -bound, bound)

    H, F, GP = HID, IN_FEAT, GATE_PAD

    # LSTM(2, 64) — PyTorch init U(-1/sqrt(H), 1/sqrt(H)); torch weight layout (4H, in).
    kb = 1.0 / math.sqrt(H)
    w_ih = uniform(next(keys), (4 * H, F), kb)
    w_hh = uniform(next(keys), (4 * H, H), kb)
    b_ih = uniform(next(keys), (4 * H,), kb)
    b_hh = uniform(next(keys), (4 * H,), kb)

    def pack_gates(w, in_dim):
        # w: (4H, in_dim) torch layout, gate order i|f|g|o. Returns (in_dim, 4*GP) with
        # each gate's transposed (in_dim, H) block left-justified in its own 128-lane
        # slot; padding is exact zeros.  Stored bf16 (halves the weight HBM->VMEM DMA).
        w4 = w.reshape(4, H, in_dim)
        out = jnp.zeros((in_dim, 4 * GP), jnp.float32)
        for g in range(4):
            out = out.at[:, g * GP: g * GP + H].set(w4[g].T)
        return out.astype(jnp.bfloat16)

    b4 = (b_ih + b_hh).reshape(4, H)
    b_packed = jnp.zeros((1, 4 * GP), jnp.float32)
    for g in range(4):
        b_packed = b_packed.at[0, g * GP: g * GP + H].set(b4[g])

    lstm = dict(
        wih=pack_gates(w_ih, F),     # (2, 512)  bf16
        whh=pack_gates(w_hh, H),     # (64, 512) bf16 — K = HID on the serial path
        b=b_packed,                  # (1, 512)  f32
    )

    # MLP with spectral norm on all layers in the zip loop (not on final 128 -> 1).
    mlp = []
    for d_in, d_out in zip(MLP_DIMS[:-1], MLP_DIMS[1:]):
        bound = 1.0 / math.sqrt(d_in)
        w = uniform(next(keys), (d_out, d_in), bound)
        bv = uniform(next(keys), (d_out,), bound)
        # TODO(synk): PyTorch spectral_norm uses a 1-step power-iteration estimate with a
        # persistent random u; here we normalize by the exact largest singular value.
        sigma = jnp.linalg.svd(w, compute_uv=False)[0]
        mlp.append([(w / sigma).T, bv[None, :]])            # (d_in, d_out), (1, d_out)
    bound = 1.0 / math.sqrt(MLP_DIMS[-1])
    w_last = uniform(next(keys), (1, MLP_DIMS[-1]), bound)  # kept as a (1, 128) row
    b_last = uniform(next(keys), (1,), bound)

    # Lane-dense zero padding (numerically identical):
    #  * W1 rows 64->128 (receives the zero pad lanes of h), cols 72->128; b1 cols 72->128.
    #  * W2 rows 72->128 (padded features are exactly zero through ReLU and BN).
    w1, b1 = mlp[0]
    mlp[0][0] = jnp.pad(w1, ((0, GP - w1.shape[0]), (0, MLP_PAD1 - w1.shape[1])))
    mlp[0][1] = jnp.pad(b1, ((0, 0), (0, MLP_PAD1 - b1.shape[1])))
    w2 = mlp[1][0]
    mlp[1][0] = jnp.pad(w2, ((0, MLP_PAD1 - w2.shape[0]), (0, 0)))

    # Weight matrices stored bf16 (zero padding stays exact); biases stay f32.
    out_mlp = [(w.astype(jnp.bfloat16), bb) for w, bb in mlp]
    out_mlp.append((w_last.astype(jnp.bfloat16), b_last.reshape(1, 1)))
    return lstm, out_mlp


if __name__ == "__main__":
    key = jax.random.PRNGKey(0)
    kp, kx1, kx2 = jax.random.split(key, 3)
    lstm_params, mlp_params = make_params(kp)

    # Small batch -> single fully fused pallas_call.
    T, B = 8, 8
    traj = jax.random.normal(kx1, (T, B, IN_FEAT), jnp.float32)   # (seq, batch, 2)
    scores = jax.block_until_ready(trajectory_discriminator(traj, lstm_params, mlp_params))
    assert scores.shape == (B, 1) and scores.dtype == jnp.float32

    # Larger batch -> batch-tiled "parallel" encoder grid + full-batch classifier
    # (BatchNorm statistics still computed over the whole batch).
    B2 = 2 * ENC_TILE_B
    traj2 = jax.random.normal(kx2, (T, B2, IN_FEAT), jnp.float32)
    scores2 = jax.block_until_ready(trajectory_discriminator(traj2, lstm_params, mlp_params))
    assert scores2.shape == (B2, 1) and scores2.dtype == jnp.float32

    print("KERNEL_OK")
</pallas_src>

<mosaic_0001>
module attributes {stable_mosaic.version = 11 : i64} {
  func.func @_fused_kernel(%arg0: memref<8x8x2xf32, #tpu.memory_space<vmem>>, %arg1: memref<2x512xbf16, #tpu.memory_space<vmem>>, %arg2: memref<64x512xbf16, #tpu.memory_space<vmem>>, %arg3: memref<1x512xf32, #tpu.memory_space<vmem>>, %arg4: memref<128x128xbf16, #tpu.memory_space<vmem>>, %arg5: memref<1x128xf32, #tpu.memory_space<vmem>>, %arg6: memref<128x512xbf16, #tpu.memory_space<vmem>>, %arg7: memref<1x512xf32, #tpu.memory_space<vmem>>, %arg8: memref<512x256xbf16, #tpu.memory_space<vmem>>, %arg9: memref<1x256xf32, #tpu.memory_space<vmem>>, %arg10: memref<256x128xbf16, #tpu.memory_space<vmem>>, %arg11: memref<1x128xf32, #tpu.memory_space<vmem>>, %arg12: memref<1x128xbf16, #tpu.memory_space<vmem>>, %arg13: memref<1x1xf32, #tpu.memory_space<vmem>>, %arg14: memref<8x1xf32, #tpu.memory_space<vmem>>) attributes {dimension_semantics = [], scalar_prefetch = 0 : i64, scratch_operands = 0 : i64, tpu.core_type = #tpu.core_type<tc>} {
    %c0 = arith.constant 0 : index
    %c0_0 = arith.constant 0 : index
    %0 = vector.load %arg1[%c0, %c0_0] : memref<2x512xbf16, #tpu.memory_space<vmem>>, vector<2x512xbf16>
    %1 = arith.extf %0 : vector<2x512xbf16> to vector<2x512xf32>
    %c0_1 = arith.constant 0 : index
    %c0_2 = arith.constant 0 : index
    %2 = vector.load %arg2[%c0_1, %c0_2] : memref<64x512xbf16, #tpu.memory_space<vmem>>, vector<64x512xbf16>
    %3 = arith.extf %2 : vector<64x512xbf16> to vector<64x512xf32>
    %c0_3 = arith.constant 0 : index
    %c0_4 = arith.constant 0 : index
    %4 = vector.load %arg3[%c0_3, %c0_4] : memref<1x512xf32, #tpu.memory_space<vmem>>, vector<1x512xf32>
    %cst = arith.constant 0.000000e+00 : f32
    %5 = vector.broadcast %cst : f32 to vector<8x128xf32>
    %cst_5 = arith.constant 0.000000e+00 : f32
    %6 = vector.broadcast %cst_5 : f32 to vector<8x128xf32>
    %c0_6 = arith.constant 0 : index
    %c0_7 = arith.constant 0 : index
    %c0_8 = arith.constant 0 : index
    %7 = vector.load %arg0[%c0_6, %c0_7, %c0_8] : memref<8x8x2xf32, #tpu.memory_space<vmem>>, vector<1x8x2xf32>
    %8 = vector.shape_cast %7 : vector<1x8x2xf32> to vector<8x2xf32>
    %9 = vector.extract_strided_slice %8 {offsets = [0, 0], sizes = [8, 1], strides = [1, 1]} : vector<8x2xf32> to vector<8x1xf32>
    %10 = vector.extract_strided_slice %1 {offsets = [0, 0], sizes = [1, 512], strides = [1, 1]} : vector<2x512xf32> to vector<1x512xf32>
    %11 = vector.broadcast %9 : vector<8x1xf32> to vector<8x512xf32>
    %12 = vector.broadcast %10 : vector<1x512xf32> to vector<8x512xf32>
    %13 = arith.mulf %11, %12 : vector<8x512xf32>
    %14 = vector.extract_strided_slice %8 {offsets = [0, 1], sizes = [8, 1], strides = [1, 1]} : vector<8x2xf32> to vector<8x1xf32>
    %15 = vector.extract_strided_slice %1 {offsets = [1, 0], sizes = [1, 512], strides = [1, 1]} : vector<2x512xf32> to vector<1x512xf32>
    %16 = vector.broadcast %14 : vector<8x1xf32> to vector<8x512xf32>
    %17 = vector.broadcast %15 : vector<1x512xf32> to vector<8x512xf32>
    %18 = arith.mulf %16, %17 : vector<8x512xf32>
    %19 = arith.addf %13, %18 : vector<8x512xf32>
    %20 = vector.broadcast %4 : vector<1x512xf32> to vector<8x512xf32>
    %21 = arith.addf %19, %20 : vector<8x512xf32>
    %22 = vector.extract_strided_slice %5 {offsets = [0, 0], sizes = [8, 64], strides = [1, 1]} : vector<8x128xf32> to vector<8x64xf32>
    %cst_9 = arith.constant dense<0.000000e+00> : vector<8x512xf32>
    %23 = tpu.matmul %22, %3, %cst_9 {dimension_numbers = #tpu.dot_dimension_numbers<[1], [0], [0], [1], [0, 0, 1, 1], [], []>} : vector<8x64xf32>, vector<64x512xf32>, vector<8x512xf32> -> vector<8x512xf32>
    %24 = arith.addf %21, %23 : vector<8x512xf32>
    %25 = vector.extract_strided_slice %24 {offsets = [0, 0], sizes = [8, 128], strides = [1, 1]} : vector<8x512xf32> to vector<8x128xf32>
    %26 = arith.negf %25 : vector<8x128xf32>
    %27 = math.exp %26 : vector<8x128xf32>
    %cst_10 = arith.constant 1.000000e+00 : f32
    %28 = vector.broadcast %cst_10 : f32 to vector<8x128xf32>
    %29 = arith.addf %28, %27 : vector<8x128xf32>
    %30 = arith.divf %28, %29 : vector<8x128xf32>
    %31 = vector.extract_strided_slice %24 {offsets = [0, 128], sizes = [8, 128], strides = [1, 1]} : vector<8x512xf32> to vector<8x128xf32>
    %32 = arith.negf %31 : vector<8x128xf32>
    %33 = math.exp %32 : vector<8x128xf32>
    %cst_11 = arith.constant 1.000000e+00 : f32
    %34 = vector.broadcast %cst_11 : f32 to vector<8x128xf32>
    %35 = arith.addf %34, %33 : vector<8x128xf32>
    %36 = arith.divf %34, %35 : vector<8x128xf32>
    %37 = vector.extract_strided_slice %24 {offsets = [0, 256], sizes = [8, 128], strides = [1, 1]} : vector<8x512xf32> to vector<8x128xf32>
    %38 = math.tanh %37 : vector<8x128xf32>
    %39 = vector.extract_strided_slice %24 {offsets = [0, 384], sizes = [8, 128], strides = [1, 1]} : vector<8x512xf32> to vector<8x128xf32>
    %40 = arith.negf %39 : vector<8x128xf32>
    %41 = math.exp %40 : vector<8x128xf32>
    %cst_12 = arith.constant 1.000000e+00 : f32
    %42 = vector.broadcast %cst_12 : f32 to vector<8x128xf32>
    %43 = arith.addf %42, %41 : vector<8x128xf32>
    %44 = arith.divf %42, %43 : vector<8x128xf32>
    %45 = arith.mulf %36, %6 : vector<8x128xf32>
    %46 = arith.mulf %30, %38 : vector<8x128xf32>
    %47 = arith.addf %45, %46 : vector<8x128xf32>
    %48 = math.tanh %47 : vector<8x128xf32>
    %49 = arith.mulf %44, %48 : vector<8x128xf32>
    %c1 = arith.constant 1 : index
    %c0_13 = arith.constant 0 : index
    %c0_14 = arith.constant 0 : index
    %50 = vector.load %arg0[%c1, %c0_13, %c0_14] : memref<8x8x2xf32, #tpu.memory_space<vmem>>, vector<1x8x2xf32>
    %51 = vector.shape_cast %50 : vector<1x8x2xf32> to vector<8x2xf32>
    %52 = vector.extract_strided_slice %51 {offsets = [0, 0], sizes = [8, 1], strides = [1, 1]} : vector<8x2xf32> to vector<8x1xf32>
    %53 = vector.extract_strided_slice %1 {offsets = [0, 0], sizes = [1, 512], strides = [1, 1]} : vector<2x512xf32> to vector<1x512xf32>
    %54 = vector.broadcast %52 : vector<8x1xf32> to vector<8x512xf32>
    %55 = vector.broadcast %53 : vector<1x512xf32> to vector<8x512xf32>
    %56 = arith.mulf %54, %55 : vector<8x512xf32>
    %57 = vector.extract_strided_slice %51 {offsets = [0, 1], sizes = [8, 1], strides = [1, 1]} : vector<8x2xf32> to vector<8x1xf32>
    %58 = vector.extract_strided_slice %1 {offsets = [1, 0], sizes = [1, 512], strides = [1, 1]} : vector<2x512xf32> to vector<1x512xf32>
    %59 = vector.broadcast %57 : vector<8x1xf32> to vector<8x512xf32>
    %60 = vector.broadcast %58 : vector<1x512xf32> to vector<8x512xf32>
    %61 = arith.mulf %59, %60 : vector<8x512xf32>
    %62 = arith.addf %56, %61 : vector<8x512xf32>
    %63 = vector.broadcast %4 : vector<1x512xf32> to vector<8x512xf32>
    %64 = arith.addf %62, %63 : vector<8x512xf32>
    %65 = vector.extract_strided_slice %49 {offsets = [0, 0], sizes = [8, 64], strides = [1, 1]} : vector<8x128xf32> to vector<8x64xf32>
    %cst_15 = arith.constant dense<0.000000e+00> : vector<8x512xf32>
    %66 = tpu.matmul %65, %3, %cst_15 {dimension_numbers = #tpu.dot_dimension_numbers<[1], [0], [0], [1], [0, 0, 1, 1], [], []>} : vector<8x64xf32>, vector<64x512xf32>, vector<8x512xf32> -> vector<8x512xf32>
    %67 = arith.addf %64, %66 : vector<8x512xf32>
    %68 = vector.extract_strided_slice %67 {offsets = [0, 0], sizes = [8, 128], strides = [1, 1]} : vector<8x512xf32> to vector<8x128xf32>
    %69 = arith.negf %68 : vector<8x128xf32>
    %70 = math.exp %69 : vector<8x128xf32>
    %cst_16 = arith.constant 1.000000e+00 : f32
    %71 = vector.broadcast %cst_16 : f32 to vector<8x128xf32>
    %72 = arith.addf %71, %70 : vector<8x128xf32>
    %73 = arith.divf %71, %72 : vector<8x128xf32>
    %74 = vector.extract_strided_slice %67 {offsets = [0, 128], sizes = [8, 128], strides = [1, 1]} : vector<8x512xf32> to vector<8x128xf32>
    %75 = arith.negf %74 : vector<8x128xf32>
    %76 = math.exp %75 : vector<8x128xf32>
    %cst_17 = arith.constant 1.000000e+00 : f32
    %77 = vector.broadcast %cst_17 : f32 to vector<8x128xf32>
    %78 = arith.addf %77, %76 : vector<8x128xf32>
    %79 = arith.divf %77, %78 : vector<8x128xf32>
    %80 = vector.extract_strided_slice %67 {offsets = [0, 256], sizes = [8, 128], strides = [1, 1]} : vector<8x512xf32> to vector<8x128xf32>
    %81 = math.tanh %80 : vector<8x128xf32>
    %82 = vector.extract_strided_slice %67 {offsets = [0, 384], sizes = [8, 128], strides = [1, 1]} : vector<8x512xf32> to vector<8x128xf32>
    %83 = arith.negf %82 : vector<8x128xf32>
    %84 = math.exp %83 : vector<8x128xf32>
    %cst_18 = arith.constant 1.000000e+00 : f32
    %85 = vector.broadcast %cst_18 : f32 to vector<8x128xf32>
    %86 = arith.addf %85, %84 : vector<8x128xf32>
    %87 = arith.divf %85, %86 : vector<8x128xf32>
    %88 = arith.mulf %79, %47 : vector<8x128xf32>
    %89 = arith.mulf %73, %81 : vector<8x128xf32>
    %90 = arith.addf %88, %89 : vector<8x128xf32>
    %91 = math.tanh %90 : vector<8x128xf32>
    %92 = arith.mulf %87, %91 : vector<8x128xf32>
    %c2 = arith.constant 2 : index
    %c0_19 = arith.constant 0 : index
    %c0_20 = arith.constant 0 : index
    %93 = vector.load %arg0[%c2, %c0_19, %c0_20] : memref<8x8x2xf32, #tpu.memory_space<vmem>>, vector<1x8x2xf32>
    %94 = vector.shape_cast %93 : vector<1x8x2xf32> to vector<8x2xf32>
    %95 = vector.extract_strided_slice %94 {offsets = [0, 0], sizes = [8, 1], strides = [1, 1]} : vector<8x2xf32> to vector<8x1xf32>
    %96 = vector.extract_strided_slice %1 {offsets = [0, 0], sizes = [1, 512], strides = [1, 1]} : vector<2x512xf32> to vector<1x512xf32>
    %97 = vector.broadcast %95 : vector<8x1xf32> to vector<8x512xf32>
    %98 = vector.broadcast %96 : vector<1x512xf32> to vector<8x512xf32>
    %99 = arith.mulf %97, %98 : vector<8x512xf32>
    %100 = vector.extract_strided_slice %94 {offsets = [0, 1], sizes = [8, 1], strides = [1, 1]} : vector<8x2xf32> to vector<8x1xf32>
    %101 = vector.extract_strided_slice %1 {offsets = [1, 0], sizes = [1, 512], strides = [1, 1]} : vector<2x512xf32> to vector<1x512xf32>
    %102 = vector.broadcast %100 : vector<8x1xf32> to vector<8x512xf32>
    %103 = vector.broadcast %101 : vector<1x512xf32> to vector<8x512xf32>
    %104 = arith.mulf %102, %103 : vector<8x512xf32>
    %105 = arith.addf %99, %104 : vector<8x512xf32>
    %106 = vector.broadcast %4 : vector<1x512xf32> to vector<8x512xf32>
    %107 = arith.addf %105, %106 : vector<8x512xf32>
    %108 = vector.extract_strided_slice %92 {offsets = [0, 0], sizes = [8, 64], strides = [1, 1]} : vector<8x128xf32> to vector<8x64xf32>
    %cst_21 = arith.constant dense<0.000000e+00> : vector<8x512xf32>
    %109 = tpu.matmul %108, %3, %cst_21 {dimension_numbers = #tpu.dot_dimension_numbers<[1], [0], [0], [1], [0, 0, 1, 1], [], []>} : vector<8x64xf32>, vector<64x512xf32>, vector<8x512xf32> -> vector<8x512xf32>
    %110 = arith.addf %107, %109 : vector<8x512xf32>
    %111 = vector.extract_strided_slice %110 {offsets = [0, 0], sizes = [8, 128], strides = [1, 1]} : vector<8x512xf32> to vector<8x128xf32>
    %112 = arith.negf %111 : vector<8x128xf32>
    %113 = math.exp %112 : vector<8x128xf32>
    %cst_22 = arith.constant 1.000000e+00 : f32
    %114 = vector.broadcast %cst_22 : f32 to vector<8x128xf32>
    %115 = arith.addf %114, %113 : vector<8x128xf32>
    %116 = arith.divf %114, %115 : vector<8x128xf32>
    %117 = vector.extract_strided_slice %110 {offsets = [0, 128], sizes = [8, 128], strides = [1, 1]} : vector<8x512xf32> to vector<8x128xf32>
    %118 = arith.negf %117 : vector<8x128xf32>
    %119 = math.exp %118 : vector<8x128xf32>
    %cst_23 = arith.constant 1.000000e+00 : f32
    %120 = vector.broadcast %cst_23 : f32 to vector<8x128xf32>
    %121 = arith.addf %120, %119 : vector<8x128xf32>
    %122 = arith.divf %120, %121 : vector<8x128xf32>
    %123 = vector.extract_strided_slice %110 {offsets = [0, 256], sizes = [8, 128], strides = [1, 1]} : vector<8x512xf32> to vector<8x128xf32>
    %124 = math.tanh %123 : vector<8x128xf32>
    %125 = vector.extract_strided_slice %110 {offsets = [0, 384], sizes = [8, 128], strides = [1, 1]} : vector<8x512xf32> to vector<8x128xf32>
    %126 = arith.negf %125 : vector<8x128xf32>
    %127 = math.exp %126 : vector<8x128xf32>
    %cst_24 = arith.constant 1.000000e+00 : f32
    %128 = vector.broadcast %cst_24 : f32 to vector<8x128xf32>
    %129 = arith.addf %128, %127 : vector<8x128xf32>
    %130 = arith.divf %128, %129 : vector<8x128xf32>
    %131 = arith.mulf %122, %90 : vector<8x128xf32>
    %132 = arith.mulf %116, %124 : vector<8x128xf32>
    %133 = arith.addf %131, %132 : vector<8x128xf32>
    %134 = math.tanh %133 : vector<8x128xf32>
    %135 = arith.mulf %130, %134 : vector<8x128xf32>
    %c3 = arith.constant 3 : index
    %c0_25 = arith.constant 0 : index
    %c0_26 = arith.constant 0 : index
    %136 = vector.load %arg0[%c3, %c0_25, %c0_26] : memref<8x8x2xf32, #tpu.memory_space<vmem>>, vector<1x8x2xf32>
    %137 = vector.shape_cast %136 : vector<1x8x2xf32> to vector<8x2xf32>
    %138 = vector.extract_strided_slice %137 {offsets = [0, 0], sizes = [8, 1], strides = [1, 1]} : vector<8x2xf32> to vector<8x1xf32>
    %139 = vector.extract_strided_slice %1 {offsets = [0, 0], sizes = [1, 512], strides = [1, 1]} : vector<2x512xf32> to vector<1x512xf32>
    %140 = vector.broadcast %138 : vector<8x1xf32> to vector<8x512xf32>
    %141 = vector.broadcast %139 : vector<1x512xf32> to vector<8x512xf32>
    %142 = arith.mulf %140, %141 : vector<8x512xf32>
    %143 = vector.extract_strided_slice %137 {offsets = [0, 1], sizes = [8, 1], strides = [1, 1]} : vector<8x2xf32> to vector<8x1xf32>
    %144 = vector.extract_strided_slice %1 {offsets = [1, 0], sizes = [1, 512], strides = [1, 1]} : vector<2x512xf32> to vector<1x512xf32>
    %145 = vector.broadcast %143 : vector<8x1xf32> to vector<8x512xf32>
    %146 = vector.broadcast %144 : vector<1x512xf32> to vector<8x512xf32>
    %147 = arith.mulf %145, %146 : vector<8x512xf32>
    %148 = arith.addf %142, %147 : vector<8x512xf32>
    %149 = vector.broadcast %4 : vector<1x512xf32> to vector<8x512xf32>
    %150 = arith.addf %148, %149 : vector<8x512xf32>
    %151 = vector.extract_strided_slice %135 {offsets = [0, 0], sizes = [8, 64], strides = [1, 1]} : vector<8x128xf32> to vector<8x64xf32>
    %cst_27 = arith.constant dense<0.000000e+00> : vector<8x512xf32>
    %152 = tpu.matmul %151, %3, %cst_27 {dimension_numbers = #tpu.dot_dimension_numbers<[1], [0], [0], [1], [0, 0, 1, 1], [], []>} : vector<8x64xf32>, vector<64x512xf32>, vector<8x512xf32> -> vector<8x512xf32>
    %153 = arith.addf %150, %152 : vector<8x512xf32>
    %154 = vector.extract_strided_slice %153 {offsets = [0, 0], sizes = [8, 128], strides = [1, 1]} : vector<8x512xf32> to vector<8x128xf32>
    %155 = arith.negf %154 : vector<8x128xf32>
    %156 = math.exp %155 : vector<8x128xf32>
    %cst_28 = arith.constant 1.000000e+00 : f32
    %157 = vector.broadcast %cst_28 : f32 to vector<8x128xf32>
    %158 = arith.addf %157, %156 : vector<8x128xf32>
    %159 = arith.divf %157, %158 : vector<8x128xf32>
    %160 = vector.extract_strided_slice %153 {offsets = [0, 128], sizes = [8, 128], strides = [1, 1]} : vector<8x512xf32> to vector<8x128xf32>
    %161 = arith.negf %160 : vector<8x128xf32>
    %162 = math.exp %161 : vector<8x128xf32>
    %cst_29 = arith.constant 1.000000e+00 : f32
    %163 = vector.broadcast %cst_29 : f32 to vector<8x128xf32>
    %164 = arith.addf %163, %162 : vector<8x128xf32>
    %165 = arith.divf %163, %164 : vector<8x128xf32>
    %166 = vector.extract_strided_slice %153 {offsets = [0, 256], sizes = [8, 128], strides = [1, 1]} : vector<8x512xf32> to vector<8x128xf32>
    %167 = math.tanh %166 : vector<8x128xf32>
    %168 = vector.extract_strided_slice %153 {offsets = [0, 384], sizes = [8, 128], strides = [1, 1]} : vector<8x512xf32> to vector<8x128xf32>
    %169 = arith.negf %168 : vector<8x128xf32>
    %170 = math.exp %169 : vector<8x128xf32>
    %cst_30 = arith.constant 1.000000e+00 : f32
    %171 = vector.broadcast %cst_30 : f32 to vector<8x128xf32>
    %172 = arith.addf %171, %170 : vector<8x128xf32>
    %173 = arith.divf %171, %172 : vector<8x128xf32>
    %174 = arith.mulf %165, %133 : vector<8x128xf32>
    %175 = arith.mulf %159, %167 : vector<8x128xf32>
    %176 = arith.addf %174, %175 : vector<8x128xf32>
    %177 = math.tanh %176 : vector<8x128xf32>
    %178 = arith.mulf %173, %177 : vector<8x128xf32>
    %c4 = arith.constant 4 : index
    %c0_31 = arith.constant 0 : index
    %c0_32 = arith.constant 0 : index
    %179 = vector.load %arg0[%c4, %c0_31, %c0_32] : memref<8x8x2xf32, #tpu.memory_space<vmem>>, vector<1x8x2xf32>
    %180 = vector.shape_cast %179 : vector<1x8x2xf32> to vector<8x2xf32>
    %181 = vector.extract_strided_slice %180 {offsets = [0, 0], sizes = [8, 1], strides = [1, 1]} : vector<8x2xf32> to vector<8x1xf32>
    %182 = vector.extract_strided_slice %1 {offsets = [0, 0], sizes = [1, 512], strides = [1, 1]} : vector<2x512xf32> to vector<1x512xf32>
    %183 = vector.broadcast %181 : vector<8x1xf32> to vector<8x512xf32>
    %184 = vector.broadcast %182 : vector<1x512xf32> to vector<8x512xf32>
    %185 = arith.mulf %183, %184 : vector<8x512xf32>
    %186 = vector.extract_strided_slice %180 {offsets = [0, 1], sizes = [8, 1], strides = [1, 1]} : vector<8x2xf32> to vector<8x1xf32>
    %187 = vector.extract_strided_slice %1 {offsets = [1, 0], sizes = [1, 512], strides = [1, 1]} : vector<2x512xf32> to vector<1x512xf32>
    %188 = vector.broadcast %186 : vector<8x1xf32> to vector<8x512xf32>
    %189 = vector.broadcast %187 : vector<1x512xf32> to vector<8x512xf32>
    %190 = arith.mulf %188, %189 : vector<8x512xf32>
    %191 = arith.addf %185, %190 : vector<8x512xf32>
    %192 = vector.broadcast %4 : vector<1x512xf32> to vector<8x512xf32>
    %193 = arith.addf %191, %192 : vector<8x512xf32>
    %194 = vector.extract_strided_slice %178 {offsets = [0, 0], sizes = [8, 64], strides = [1, 1]} : vector<8x128xf32> to vector<8x64xf32>
    %cst_33 = arith.constant dense<0.000000e+00> : vector<8x512xf32>
    %195 = tpu.matmul %194, %3, %cst_33 {dimension_numbers = #tpu.dot_dimension_numbers<[1], [0], [0], [1], [0, 0, 1, 1], [], []>} : vector<8x64xf32>, vector<64x512xf32>, vector<8x512xf32> -> vector<8x512xf32>
    %196 = arith.addf %193, %195 : vector<8x512xf32>
    %197 = vector.extract_strided_slice %196 {offsets = [0, 0], sizes = [8, 128], strides = [1, 1]} : vector<8x512xf32> to vector<8x128xf32>
    %198 = arith.negf %197 : vector<8x128xf32>
    %199 = math.exp %198 : vector<8x128xf32>
    %cst_34 = arith.constant 1.000000e+00 : f32
    %200 = vector.broadcast %cst_34 : f32 to vector<8x128xf32>
    %201 = arith.addf %200, %199 : vector<8x128xf32>
    %202 = arith.divf %200, %201 : vector<8x128xf32>
    %203 = vector.extract_strided_slice %196 {offsets = [0, 128], sizes = [8, 128], strides = [1, 1]} : vector<8x512xf32> to vector<8x128xf32>
    %204 = arith.negf %203 : vector<8x128xf32>
    %205 = math.exp %204 : vector<8x128xf32>
    %cst_35 = arith.constant 1.000000e+00 : f32
    %206 = vector.broadcast %cst_35 : f32 to vector<8x128xf32>
    %207 = arith.addf %206, %205 : vector<8x128xf32>
    %208 = arith.divf %206, %207 : vector<8x128xf32>
    %209 = vector.extract_strided_slice %196 {offsets = [0, 256], sizes = [8, 128], strides = [1, 1]} : vector<8x512xf32> to vector<8x128xf32>
    %210 = math.tanh %209 : vector<8x128xf32>
    %211 = vector.extract_strided_slice %196 {offsets = [0, 384], sizes = [8, 128], strides = [1, 1]} : vector<8x512xf32> to vector<8x128xf32>
    %212 = arith.negf %211 : vector<8x128xf32>
    %213 = math.exp %212 : vector<8x128xf32>
    %cst_36 = arith.constant 1.000000e+00 : f32
    %214 = vector.broadcast %cst_36 : f32 to vector<8x128xf32>
    %215 = arith.addf %214, %213 : vector<8x128xf32>
    %216 = arith.divf %214, %215 : vector<8x128xf32>
    %217 = arith.mulf %208, %176 : vector<8x128xf32>
    %218 = arith.mulf %202, %210 : vector<8x128xf32>
    %219 = arith.addf %217, %218 : vector<8x128xf32>
    %220 = math.tanh %219 : vector<8x128xf32>
    %221 = arith.mulf %216, %220 : vector<8x128xf32>
    %c5 = arith.constant 5 : index
    %c0_37 = arith.constant 0 : index
    %c0_38 = arith.constant 0 : index
    %222 = vector.load %arg0[%c5, %c0_37, %c0_38] : memref<8x8x2xf32, #tpu.memory_space<vmem>>, vector<1x8x2xf32>
    %223 = vector.shape_cast %222 : vector<1x8x2xf32> to vector<8x2xf32>
    %224 = vector.extract_strided_slice %223 {offsets = [0, 0], sizes = [8, 1], strides = [1, 1]} : vector<8x2xf32> to vector<8x1xf32>
    %225 = vector.extract_strided_slice %1 {offsets = [0, 0], sizes = [1, 512], strides = [1, 1]} : vector<2x512xf32> to vector<1x512xf32>
    %226 = vector.broadcast %224 : vector<8x1xf32> to vector<8x512xf32>
    %227 = vector.broadcast %225 : vector<1x512xf32> to vector<8x512xf32>
    %228 = arith.mulf %226, %227 : vector<8x512xf32>
    %229 = vector.extract_strided_slice %223 {offsets = [0, 1], sizes = [8, 1], strides = [1, 1]} : vector<8x2xf32> to vector<8x1xf32>
    %230 = vector.extract_strided_slice %1 {offsets = [1, 0], sizes = [1, 512], strides = [1, 1]} : vector<2x512xf32> to vector<1x512xf32>
    %231 = vector.broadcast %229 : vector<8x1xf32> to vector<8x512xf32>
    %232 = vector.broadcast %230 : vector<1x512xf32> to vector<8x512xf32>
    %233 = arith.mulf %231, %232 : vector<8x512xf32>
    %234 = arith.addf %228, %233 : vector<8x512xf32>
    %235 = vector.broadcast %4 : vector<1x512xf32> to vector<8x512xf32>
    %236 = arith.addf %234, %235 : vector<8x512xf32>
    %237 = vector.extract_strided_slice %221 {offsets = [0, 0], sizes = [8, 64], strides = [1, 1]} : vector<8x128xf32> to vector<8x64xf32>
    %cst_39 = arith.constant dense<0.000000e+00> : vector<8x512xf32>
    %238 = tpu.matmul %237, %3, %cst_39 {dimension_numbers = #tpu.dot_dimension_numbers<[1], [0], [0], [1], [0, 0, 1, 1], [], []>} : vector<8x64xf32>, vector<64x512xf32>, vector<8x512xf32> -> vector<8x512xf32>
    %239 = arith.addf %236, %238 : vector<8x512xf32>
    %240 = vector.extract_strided_slice %239 {offsets = [0, 0], sizes = [8, 128], strides = [1, 1]} : vector<8x512xf32> to vector<8x128xf32>
    %241 = arith.negf %240 : vector<8x128xf32>
    %242 = math.exp %241 : vector<8x128xf32>
    %cst_40 = arith.constant 1.000000e+00 : f32
    %243 = vector.broadcast %cst_40 : f32 to vector<8x128xf32>
    %244 = arith.addf %243, %242 : vector<8x128xf32>
    %245 = arith.divf %243, %244 : vector<8x128xf32>
    %246 = vector.extract_strided_slice %239 {offsets = [0, 128], sizes = [8, 128], strides = [1, 1]} : vector<8x512xf32> to vector<8x128xf32>
    %247 = arith.negf %246 : vector<8x128xf32>
    %248 = math.exp %247 : vector<8x128xf32>
    %cst_41 = arith.constant 1.000000e+00 : f32
    %249 = vector.broadcast %cst_41 : f32 to vector<8x128xf32>
    %250 = arith.addf %249, %248 : vector<8x128xf32>
    %251 = arith.divf %249, %250 : vector<8x128xf32>
    %252 = vector.extract_strided_slice %239 {offsets = [0, 256], sizes = [8, 128], strides = [1, 1]} : vector<8x512xf32> to vector<8x128xf32>
    %253 = math.tanh %252 : vector<8x128xf32>
    %254 = vector.extract_strided_slice %239 {offsets = [0, 384], sizes = [8, 128], strides = [1, 1]} : vector<8x512xf32> to vector<8x128xf32>
    %255 = arith.negf %254 : vector<8x128xf32>
    %256 = math.exp %255 : vector<8x128xf32>
    %cst_42 = arith.constant 1.000000e+00 : f32
    %257 = vector.broadcast %cst_42 : f32 to vector<8x128xf32>
    %258 = arith.addf %257, %256 : vector<8x128xf32>
    %259 = arith.divf %257, %258 : vector<8x128xf32>
    %260 = arith.mulf %251, %219 : vector<8x128xf32>
    %261 = arith.mulf %245, %253 : vector<8x128xf32>
    %262 = arith.addf %260, %261 : vector<8x128xf32>
    %263 = math.tanh %262 : vector<8x128xf32>
    %264 = arith.mulf %259, %263 : vector<8x128xf32>
    %c6 = arith.constant 6 : index
    %c0_43 = arith.constant 0 : index
    %c0_44 = arith.constant 0 : index
    %265 = vector.load %arg0[%c6, %c0_43, %c0_44] : memref<8x8x2xf32, #tpu.memory_space<vmem>>, vector<1x8x2xf32>
    %266 = vector.shape_cast %265 : vector<1x8x2xf32> to vector<8x2xf32>
    %267 = vector.extract_strided_slice %266 {offsets = [0, 0], sizes = [8, 1], strides = [1, 1]} : vector<8x2xf32> to vector<8x1xf32>
    %268 = vector.extract_strided_slice %1 {offsets = [0, 0], sizes = [1, 512], strides = [1, 1]} : vector<2x512xf32> to vector<1x512xf32>
    %269 = vector.broadcast %267 : vector<8x1xf32> to vector<8x512xf32>
    %270 = vector.broadcast %268 : vector<1x512xf32> to vector<8x512xf32>
    %271 = arith.mulf %269, %270 : vector<8x512xf32>
    %272 = vector.extract_strided_slice %266 {offsets = [0, 1], sizes = [8, 1], strides = [1, 1]} : vector<8x2xf32> to vector<8x1xf32>
    %273 = vector.extract_strided_slice %1 {offsets = [1, 0], sizes = [1, 512], strides = [1, 1]} : vector<2x512xf32> to vector<1x512xf32>
    %274 = vector.broadcast %272 : vector<8x1xf32> to vector<8x512xf32>
    %275 = vector.broadcast %273 : vector<1x512xf32> to vector<8x512xf32>
    %276 = arith.mulf %274, %275 : vector<8x512xf32>
    %277 = arith.addf %271, %276 : vector<8x512xf32>
    %278 = vector.broadcast %4 : vector<1x512xf32> to vector<8x512xf32>
    %279 = arith.addf %277, %278 : vector<8x512xf32>
    %280 = vector.extract_strided_slice %264 {offsets = [0, 0], sizes = [8, 64], strides = [1, 1]} : vector<8x128xf32> to vector<8x64xf32>
    %cst_45 = arith.constant dense<0.000000e+00> : vector<8x512xf32>
    %281 = tpu.matmul %280, %3, %cst_45 {dimension_numbers = #tpu.dot_dimension_numbers<[1], [0], [0], [1], [0, 0, 1, 1], [], []>} : vector<8x64xf32>, vector<64x512xf32>, vector<8x512xf32> -> vector<8x512xf32>
    %282 = arith.addf %279, %281 : vector<8x512xf32>
    %283 = vector.extract_strided_slice %282 {offsets = [0, 0], sizes = [8, 128], strides = [1, 1]} : vector<8x512xf32> to vector<8x128xf32>
    %284 = arith.negf %283 : vector<8x128xf32>
    %285 = math.exp %284 : vector<8x128xf32>
    %cst_46 = arith.constant 1.000000e+00 : f32
    %286 = vector.broadcast %cst_46 : f32 to vector<8x128xf32>
    %287 = arith.addf %286, %285 : vector<8x128xf32>
    %288 = arith.divf %286, %287 : vector<8x128xf32>
    %289 = vector.extract_strided_slice %282 {offsets = [0, 128], sizes = [8, 128], strides = [1, 1]} : vector<8x512xf32> to vector<8x128xf32>
    %290 = arith.negf %289 : vector<8x128xf32>
    %291 = math.exp %290 : vector<8x128xf32>
    %cst_47 = arith.constant 1.000000e+00 : f32
    %292 = vector.broadcast %cst_47 : f32 to vector<8x128xf32>
    %293 = arith.addf %292, %291 : vector<8x128xf32>
    %294 = arith.divf %292, %293 : vector<8x128xf32>
    %295 = vector.extract_strided_slice %282 {offsets = [0, 256], sizes = [8, 128], strides = [1, 1]} : vector<8x512xf32> to vector<8x128xf32>
    %296 = math.tanh %295 : vector<8x128xf32>
    %297 = vector.extract_strided_slice %282 {offsets = [0, 384], sizes = [8, 128], strides = [1, 1]} : vector<8x512xf32> to vector<8x128xf32>
    %298 = arith.negf %297 : vector<8x128xf32>
    %299 = math.exp %298 : vector<8x128xf32>
    %cst_48 = arith.constant 1.000000e+00 : f32
    %300 = vector.broadcast %cst_48 : f32 to vector<8x128xf32>
    %301 = arith.addf %300, %299 : vector<8x128xf32>
    %302 = arith.divf %300, %301 : vector<8x128xf32>
    %303 = arith.mulf %294, %262 : vector<8x128xf32>
    %304 = arith.mulf %288, %296 : vector<8x128xf32>
    %305 = arith.addf %303, %304 : vector<8x128xf32>
    %306 = math.tanh %305 : vector<8x128xf32>
    %307 = arith.mulf %302, %306 : vector<8x128xf32>
    %c7 = arith.constant 7 : index
    %c0_49 = arith.constant 0 : index
    %c0_50 = arith.constant 0 : index
    %308 = vector.load %arg0[%c7, %c0_49, %c0_50] : memref<8x8x2xf32, #tpu.memory_space<vmem>>, vector<1x8x2xf32>
    %309 = vector.shape_cast %308 : vector<1x8x2xf32> to vector<8x2xf32>
    %310 = vector.extract_strided_slice %309 {offsets = [0, 0], sizes = [8, 1], strides = [1, 1]} : vector<8x2xf32> to vector<8x1xf32>
    %311 = vector.extract_strided_slice %1 {offsets = [0, 0], sizes = [1, 512], strides = [1, 1]} : vector<2x512xf32> to vector<1x512xf32>
    %312 = vector.broadcast %310 : vector<8x1xf32> to vector<8x512xf32>
    %313 = vector.broadcast %311 : vector<1x512xf32> to vector<8x512xf32>
    %314 = arith.mulf %312, %313 : vector<8x512xf32>
    %315 = vector.extract_strided_slice %309 {offsets = [0, 1], sizes = [8, 1], strides = [1, 1]} : vector<8x2xf32> to vector<8x1xf32>
    %316 = vector.extract_strided_slice %1 {offsets = [1, 0], sizes = [1, 512], strides = [1, 1]} : vector<2x512xf32> to vector<1x512xf32>
    %317 = vector.broadcast %315 : vector<8x1xf32> to vector<8x512xf32>
    %318 = vector.broadcast %316 : vector<1x512xf32> to vector<8x512xf32>
    %319 = arith.mulf %317, %318 : vector<8x512xf32>
    %320 = arith.addf %314, %319 : vector<8x512xf32>
    %321 = vector.broadcast %4 : vector<1x512xf32> to vector<8x512xf32>
    %322 = arith.addf %320, %321 : vector<8x512xf32>
    %323 = vector.extract_strided_slice %307 {offsets = [0, 0], sizes = [8, 64], strides = [1, 1]} : vector<8x128xf32> to vector<8x64xf32>
    %cst_51 = arith.constant dense<0.000000e+00> : vector<8x512xf32>
    %324 = tpu.matmul %323, %3, %cst_51 {dimension_numbers = #tpu.dot_dimension_numbers<[1], [0], [0], [1], [0, 0, 1, 1], [], []>} : vector<8x64xf32>, vector<64x512xf32>, vector<8x512xf32> -> vector<8x512xf32>
    %325 = arith.addf %322, %324 : vector<8x512xf32>
    %326 = vector.extract_strided_slice %325 {offsets = [0, 0], sizes = [8, 128], strides = [1, 1]} : vector<8x512xf32> to vector<8x128xf32>
    %327 = arith.negf %326 : vector<8x128xf32>
    %328 = math.exp %327 : vector<8x128xf32>
    %cst_52 = arith.constant 1.000000e+00 : f32
    %329 = vector.broadcast %cst_52 : f32 to vector<8x128xf32>
    %330 = arith.addf %329, %328 : vector<8x128xf32>
    %331 = arith.divf %329, %330 : vector<8x128xf32>
    %332 = vector.extract_strided_slice %325 {offsets = [0, 128], sizes = [8, 128], strides = [1, 1]} : vector<8x512xf32> to vector<8x128xf32>
    %333 = arith.negf %332 : vector<8x128xf32>
    %334 = math.exp %333 : vector<8x128xf32>
    %cst_53 = arith.constant 1.000000e+00 : f32
    %335 = vector.broadcast %cst_53 : f32 to vector<8x128xf32>
    %336 = arith.addf %335, %334 : vector<8x128xf32>
    %337 = arith.divf %335, %336 : vector<8x128xf32>
    %338 = vector.extract_strided_slice %325 {offsets = [0, 256], sizes = [8, 128], strides = [1, 1]} : vector<8x512xf32> to vector<8x128xf32>
    %339 = math.tanh %338 : vector<8x128xf32>
    %340 = vector.extract_strided_slice %325 {offsets = [0, 384], sizes = [8, 128], strides = [1, 1]} : vector<8x512xf32> to vector<8x128xf32>
    %341 = arith.negf %340 : vector<8x128xf32>
    %342 = math.exp %341 : vector<8x128xf32>
    %cst_54 = arith.constant 1.000000e+00 : f32
    %343 = vector.broadcast %cst_54 : f32 to vector<8x128xf32>
    %344 = arith.addf %343, %342 : vector<8x128xf32>
    %345 = arith.divf %343, %344 : vector<8x128xf32>
    %346 = arith.mulf %337, %305 : vector<8x128xf32>
    %347 = arith.mulf %331, %339 : vector<8x128xf32>
    %348 = arith.addf %346, %347 : vector<8x128xf32>
    %349 = math.tanh %348 : vector<8x128xf32>
    %350 = arith.mulf %345, %349 : vector<8x128xf32>
    %c0_55 = arith.constant 0 : index
    %c0_56 = arith.constant 0 : index
    %351 = vector.load %arg4[%c0_55, %c0_56] : memref<128x128xbf16, #tpu.memory_space<vmem>>, vector<128x128xbf16>
    %352 = arith.extf %351 : vector<128x128xbf16> to vector<128x128xf32>
    %cst_57 = arith.constant dense<0.000000e+00> : vector<8x128xf32>
    %353 = tpu.matmul %350, %352, %cst_57 {dimension_numbers = #tpu.dot_dimension_numbers<[1], [0], [0], [1], [0, 0, 1, 1], [], []>} : vector<8x128xf32>, vector<128x128xf32>, vector<8x128xf32> -> vector<8x128xf32>
    %c0_58 = arith.constant 0 : index
    %c0_59 = arith.constant 0 : index
    %354 = vector.load %arg5[%c0_58, %c0_59] : memref<1x128xf32, #tpu.memory_space<vmem>>, vector<1x128xf32>
    %355 = vector.broadcast %354 : vector<1x128xf32> to vector<8x128xf32>
    %356 = arith.addf %353, %355 : vector<8x128xf32>
    %cst_60 = arith.constant 0.000000e+00 : f32
    %357 = vector.broadcast %cst_60 : f32 to vector<8x128xf32>
    %358 = arith.maximumf %356, %357 : vector<8x128xf32>
    %cst_61 = arith.constant dense<0.000000e+00> : vector<128xf32>
    %359 = vector.multi_reduction <add>, %358, %cst_61 [0] : vector<8x128xf32> to vector<128xf32>
    %360 = vector.shape_cast %359 : vector<128xf32> to vector<1x128xf32>
    %cst_62 = arith.constant 8.000000e+00 : f32
    %361 = vector.broadcast %cst_62 : f32 to vector<1x128xf32>
    %362 = arith.divf %360, %361 : vector<1x128xf32>
    %363 = vector.broadcast %362 : vector<1x128xf32> to vector<8x128xf32>
    %364 = arith.subf %358, %363 : vector<8x128xf32>
    %365 = arith.mulf %364, %364 : vector<8x128xf32>
    %cst_63 = arith.constant dense<0.000000e+00> : vector<128xf32>
    %366 = vector.multi_reduction <add>, %365, %cst_63 [0] : vector<8x128xf32> to vector<128xf32>
    %367 = vector.shape_cast %366 : vector<128xf32> to vector<1x128xf32>
    %cst_64 = arith.constant 8.000000e+00 : f32
    %368 = vector.broadcast %cst_64 : f32 to vector<1x128xf32>
    %369 = arith.divf %367, %368 : vector<1x128xf32>
    %370 = vector.broadcast %362 : vector<1x128xf32> to vector<8x128xf32>
    %371 = arith.subf %358, %370 : vector<8x128xf32>
    %cst_65 = arith.constant 9.99999974E-6 : f32
    %372 = vector.broadcast %cst_65 : f32 to vector<1x128xf32>
    %373 = arith.addf %369, %372 : vector<1x128xf32>
    %374 = math.rsqrt %373 : vector<1x128xf32>
    %375 = vector.broadcast %374 : vector<1x128xf32> to vector<8x128xf32>
    %376 = arith.mulf %371, %375 : vector<8x128xf32>
    %c0_66 = arith.constant 0 : index
    %c0_67 = arith.constant 0 : index
    %377 = vector.load %arg6[%c0_66, %c0_67] : memref<128x512xbf16, #tpu.memory_space<vmem>>, vector<128x512xbf16>
    %378 = arith.extf %377 : vector<128x512xbf16> to vector<128x512xf32>
    %cst_68 = arith.constant dense<0.000000e+00> : vector<8x512xf32>
    %379 = tpu.matmul %376, %378, %cst_68 {dimension_numbers = #tpu.dot_dimension_numbers<[1], [0], [0], [1], [0, 0, 1, 1], [], []>} : vector<8x128xf32>, vector<128x512xf32>, vector<8x512xf32> -> vector<8x512xf32>
    %c0_69 = arith.constant 0 : index
    %c0_70 = arith.constant 0 : index
    %380 = vector.load %arg7[%c0_69, %c0_70] : memref<1x512xf32, #tpu.memory_space<vmem>>, vector<1x512xf32>
    %381 = vector.broadcast %380 : vector<1x512xf32> to vector<8x512xf32>
    %382 = arith.addf %379, %381 : vector<8x512xf32>
    %cst_71 = arith.constant 0.000000e+00 : f32
    %383 = vector.broadcast %cst_71 : f32 to vector<8x512xf32>
    %384 = arith.maximumf %382, %383 : vector<8x512xf32>
    %cst_72 = arith.constant dense<0.000000e+00> : vector<512xf32>
    %385 = vector.multi_reduction <add>, %384, %cst_72 [0] : vector<8x512xf32> to vector<512xf32>
    %386 = vector.shape_cast %385 : vector<512xf32> to vector<1x512xf32>
    %cst_73 = arith.constant 8.000000e+00 : f32
    %387 = vector.broadcast %cst_73 : f32 to vector<1x512xf32>
    %388 = arith.divf %386, %387 : vector<1x512xf32>
    %389 = vector.broadcast %388 : vector<1x512xf32> to vector<8x512xf32>
    %390 = arith.subf %384, %389 : vector<8x512xf32>
    %391 = arith.mulf %390, %390 : vector<8x512xf32>
    %cst_74 = arith.constant dense<0.000000e+00> : vector<512xf32>
    %392 = vector.multi_reduction <add>, %391, %cst_74 [0] : vector<8x512xf32> to vector<512xf32>
    %393 = vector.shape_cast %392 : vector<512xf32> to vector<1x512xf32>
    %cst_75 = arith.constant 8.000000e+00 : f32
    %394 = vector.broadcast %cst_75 : f32 to vector<1x512xf32>
    %395 = arith.divf %393, %394 : vector<1x512xf32>
    %396 = vector.broadcast %388 : vector<1x512xf32> to vector<8x512xf32>
    %397 = arith.subf %384, %396 : vector<8x512xf32>
    %cst_76 = arith.constant 9.99999974E-6 : f32
    %398 = vector.broadcast %cst_76 : f32 to vector<1x512xf32>
    %399 = arith.addf %395, %398 : vector<1x512xf32>
    %400 = math.rsqrt %399 : vector<1x512xf32>
    %401 = vector.broadcast %400 : vector<1x512xf32> to vector<8x512xf32>
    %402 = arith.mulf %397, %401 : vector<8x512xf32>
    %c0_77 = arith.constant 0 : index
    %c0_78 = arith.constant 0 : index
    %403 = vector.load %arg8[%c0_77, %c0_78] : memref<512x256xbf16, #tpu.memory_space<vmem>>, vector<512x256xbf16>
    %404 = arith.extf %403 : vector<512x256xbf16> to vector<512x256xf32>
    %cst_79 = arith.constant dense<0.000000e+00> : vector<8x256xf32>
    %405 = tpu.matmul %402, %404, %cst_79 {dimension_numbers = #tpu.dot_dimension_numbers<[1], [0], [0], [1], [0, 0, 1, 1], [], []>} : vector<8x512xf32>, vector<512x256xf32>, vector<8x256xf32> -> vector<8x256xf32>
    %c0_80 = arith.constant 0 : index
    %c0_81 = arith.constant 0 : index
    %406 = vector.load %arg9[%c0_80, %c0_81] : memref<1x256xf32, #tpu.memory_space<vmem>>, vector<1x256xf32>
    %407 = vector.broadcast %406 : vector<1x256xf32> to vector<8x256xf32>
    %408 = arith.addf %405, %407 : vector<8x256xf32>
    %cst_82 = arith.constant 0.000000e+00 : f32
    %409 = vector.broadcast %cst_82 : f32 to vector<8x256xf32>
    %410 = arith.maximumf %408, %409 : vector<8x256xf32>
    %cst_83 = arith.constant dense<0.000000e+00> : vector<256xf32>
    %411 = vector.multi_reduction <add>, %410, %cst_83 [0] : vector<8x256xf32> to vector<256xf32>
    %412 = vector.shape_cast %411 : vector<256xf32> to vector<1x256xf32>
    %cst_84 = arith.constant 8.000000e+00 : f32
    %413 = vector.broadcast %cst_84 : f32 to vector<1x256xf32>
    %414 = arith.divf %412, %413 : vector<1x256xf32>
    %415 = vector.broadcast %414 : vector<1x256xf32> to vector<8x256xf32>
    %416 = arith.subf %410, %415 : vector<8x256xf32>
    %417 = arith.mulf %416, %416 : vector<8x256xf32>
    %cst_85 = arith.constant dense<0.000000e+00> : vector<256xf32>
    %418 = vector.multi_reduction <add>, %417, %cst_85 [0] : vector<8x256xf32> to vector<256xf32>
    %419 = vector.shape_cast %418 : vector<256xf32> to vector<1x256xf32>
    %cst_86 = arith.constant 8.000000e+00 : f32
    %420 = vector.broadcast %cst_86 : f32 to vector<1x256xf32>
    %421 = arith.divf %419, %420 : vector<1x256xf32>
    %422 = vector.broadcast %414 : vector<1x256xf32> to vector<8x256xf32>
    %423 = arith.subf %410, %422 : vector<8x256xf32>
    %cst_87 = arith.constant 9.99999974E-6 : f32
    %424 = vector.broadcast %cst_87 : f32 to vector<1x256xf32>
    %425 = arith.addf %421, %424 : vector<1x256xf32>
    %426 = math.rsqrt %425 : vector<1x256xf32>
    %427 = vector.broadcast %426 : vector<1x256xf32> to vector<8x256xf32>
    %428 = arith.mulf %423, %427 : vector<8x256xf32>
    %c0_88 = arith.constant 0 : index
    %c0_89 = arith.constant 0 : index
    %429 = vector.load %arg10[%c0_88, %c0_89] : memref<256x128xbf16, #tpu.memory_space<vmem>>, vector<256x128xbf16>
    %430 = arith.extf %429 : vector<256x128xbf16> to vector<256x128xf32>
    %cst_90 = arith.constant dense<0.000000e+00> : vector<8x128xf32>
    %431 = tpu.matmul %428, %430, %cst_90 {dimension_numbers = #tpu.dot_dimension_numbers<[1], [0], [0], [1], [0, 0, 1, 1], [], []>} : vector<8x256xf32>, vector<256x128xf32>, vector<8x128xf32> -> vector<8x128xf32>
    %c0_91 = arith.constant 0 : index
    %c0_92 = arith.constant 0 : index
    %432 = vector.load %arg11[%c0_91, %c0_92] : memref<1x128xf32, #tpu.memory_space<vmem>>, vector<1x128xf32>
    %433 = vector.broadcast %432 : vector<1x128xf32> to vector<8x128xf32>
    %434 = arith.addf %431, %433 : vector<8x128xf32>
    %cst_93 = arith.constant 0.000000e+00 : f32
    %435 = vector.broadcast %cst_93 : f32 to vector<8x128xf32>
    %436 = arith.maximumf %434, %435 : vector<8x128xf32>
    %c0_94 = arith.constant 0 : index
    %c0_95 = arith.constant 0 : index
    %437 = vector.load %arg12[%c0_94, %c0_95] : memref<1x128xbf16, #tpu.memory_space<vmem>>, vector<1x128xbf16>
    %438 = arith.extf %437 : vector<1x128xbf16> to vector<1x128xf32>
    %439 = vector.broadcast %438 : vector<1x128xf32> to vector<8x128xf32>
    %440 = arith.mulf %436, %439 : vector<8x128xf32>
    %cst_96 = arith.constant dense<0.000000e+00> : vector<8xf32>
    %441 = vector.multi_reduction <add>, %440, %cst_96 [1] : vector<8x128xf32> to vector<8xf32>
    %442 = vector.shape_cast %441 : vector<8xf32> to vector<8x1xf32>
    %c0_97 = arith.constant 0 : index
    %c0_98 = arith.constant 0 : index
    %443 = vector.load %arg13[%c0_97, %c0_98] : memref<1x1xf32, #tpu.memory_space<vmem>>, vector<1x1xf32>
    %444 = vector.broadcast %443 : vector<1x1xf32> to vector<8x1xf32>
    %445 = arith.addf %442, %444 : vector<8x1xf32>
    %c0_99 = arith.constant 0 : index
    %c0_100 = arith.constant 0 : index
    %446 = vector.load %arg14[%c0_99, %c0_100] : memref<8x1xf32, #tpu.memory_space<vmem>>, vector<8x1xf32>
    tpu.vector_store %arg14[%c0_99, %c0_100], %445 {strides = array<i32>} : memref<8x1xf32, #tpu.memory_space<vmem>>, vector<8x1xf32>,
    return
  }
}

</mosaic_0001>

<bundles_post_ra>
// kernel: trajectory_discriminator.1
= control target key start
LH: loop header
LB: loop body
LE: loop exit
PB: predicated region body
PF: predicated region fallthrough
CT: control target
= control target key end

     0   :  { %s5018_s0 = inlined_call_operand.vmem [shape: f32[8,8,2], index: 0, kind: input, shape index: {}]   ;;  %s5019_s1 = inlined_call_operand.vmem [shape: bf16[2,512], index: 1, kind: input, shape index: {}]   ;;  %s5020_s2 = inlined_call_operand.hbm [shape: bf16[64,512], index: 2, kind: input, shape index: {}]   ;;  %s5021_s3 = inlined_call_operand.vmem [shape: f32[1,512], index: 3, kind: input, shape index: {}]   ;;  %s5022_s4 = inlined_call_operand.vmem [shape: bf16[128,128], index: 4, kind: input, shape index: {}]   ;;  %s5023_s5 = inlined_call_operand.vmem [shape: f32[1,128], index: 5, kind: input, shape index: {}]   ;;  %s5024_s6 = inlined_call_operand.hbm [shape: bf16[128,512], index: 6, kind: input, shape index: {}]   ;;  %s5025_s7 = inlined_call_operand.vmem [shape: f32[1,512], index: 7, kind: input, shape index: {}]   ;;  %s5026_s8 = inlined_call_operand.hbm [shape: bf16[512,256], index: 8, kind: input, shape index: {}]   ;;  %s5027_s9 = inlined_call_operand.vmem [shape: f32[1,256], index: 9, kind: input, shape index: {}]   ;;  %s5028_s10 = inlined_call_operand.hbm [shape: bf16[256,128], index: 10, kind: input, shape index: {}]   ;;  %s5029_s11 = inlined_call_operand.vmem [shape: f32[1,128], index: 11, kind: input, shape index: {}]   ;;  %s5030_s12 = inlined_call_operand.vmem [shape: bf16[1,128], index: 12, kind: input, shape index: {}]   ;;  %s5031_s13 = inlined_call_operand.<no memory space> [shape: f32[1,1], index: 13, kind: input, shape index: {}]   ;;  %s5032_s14 = inlined_call_operand.vmem [shape: f32[8,1], index: 14, kind: output, shape index: {}]  }
   0x1   :  { %v19_v0 = vstv %s5031_s13 }
   0x2   :  { %20 = vst [vmem:[#allocation2] sm:$0x1] %v19_v0 }
   0x3   :  { %21 = vsyncpa [#allocation4], 0 }
   0x4   :  { %22 = vsyncpa [#allocation6], 0 }
   0x5   :  { %23 = vsyncpa [#allocation9], 0  ;;  %s4298_s15 = smov [#allocation5]   ;;  %s4299_s17 = smov [#allocation3]  }
   0x6   :  { %s51_s16 = sshll.u32 %s4298_s15, 4  ;;  %s33_s18 = sshll.u32 %s4299_s17, 4  ;;  %s52_s16 = int_to_ptr.vmem [resolvable:$true] %s51_s16  ;;  %s4391_s18 = int_to_ptr.vmem [resolvable:$true] %s33_s18 }
   0x7   :  { %s4204_s21 = scalar_lea.hbm %s5024_s6, 4096 }
   0x8   :  { %p4205_p0 = scmp.ne.s32.totalorder %s5024_s6, %s4204_s21  ;;  %p4208_p1 = scmp.lt.u32.totalorder %s4204_s21, %s5024_s6 }
   0xa   :  { %p4210_p2 = pnand %p4208_p1, %p4205_p0 }
   0xc   :  { %4213 = shalt.err (!%p4210_p2)
}
   0xd   :  { %s4214_s25 = scalar_lea.vmem %s52_s16, 4096  ;;  %p4219_p4 = scmp.lt.s32.totalorder %s52_s16, %s52_s16 }
   0xe   :  { %p4215_p3 = scmp.ne.s32.totalorder %s52_s16, %s4214_s25  ;;  %p4220_p5 = scmp.lt.s32.totalorder %s4214_s25, %s4214_s25 }
  0x10   :  { %p4221_p6 = por %p4220_p5, %p4219_p4 }
  0x12   :  { %p4222_p7 = pnand %p4221_p6, %p4215_p3 }
  0x14   :  { %4225 = shalt.err (!%p4222_p7)
}
  0x15   :  { %s4300_s26 = smov 256   ;;  %s4301_s27 = smov 16  }
  0x16   :  { %57 = dma.hbm_to_vmem [thread:$0]  %s5024_s6, 4096, %s52_s16, [#allocation6], %s4300_s26, %s4300_s26, %s4301_s27  }
  0x17   :  { %s4226_s17 = scalar_lea.hbm %s5020_s2, 2048 }
  0x18   :  { %p4227_p8 = scmp.ne.s32.totalorder %s5020_s2, %s4226_s17  ;;  %p4230_p9 = scmp.lt.u32.totalorder %s4226_s17, %s5020_s2 }
  0x1a   :  { %p4232_p10 = pnand %p4230_p9, %p4227_p8 }
  0x1c   :  { %4235 = shalt.err (!%p4232_p10)
}
  0x1d   :  { %s4236_s23 = scalar_lea.vmem %s4391_s18, 2048  ;;  %p4241_p12 = scmp.lt.s32.totalorder %s4391_s18, %s4391_s18 }
  0x1e   :  { %p4237_p11 = scmp.ne.s32.totalorder %s4391_s18, %s4236_s23  ;;  %p4242_p13 = scmp.lt.s32.totalorder %s4236_s23, %s4236_s23 }
  0x20   :  { %p4243_p0 = por %p4242_p13, %p4241_p12 }
  0x22   :  { %p4244_p1 = pnand %p4243_p0, %p4237_p11 }
  0x24   :  { %4247 = shalt.err (!%p4244_p1)
}
  0x25   :  { %39 = dma.hbm_to_vmem [thread:$0]  %s5020_s2, 2048, %s4391_s18, [#allocation4], %s4300_s26, %s4300_s26, %s4301_s27  }
  0x26   :  { %s4302_s13 = smov [#allocation7]   ;;  %s4248_s29 = scalar_lea.hbm %s5026_s8, 8192 }
  0x27   :  { %s65_s24 = sshll.u32 %s4302_s13, 4  ;;  %p4249_p2 = scmp.ne.s32.totalorder %s5026_s8, %s4248_s29  ;;  %s66_s24 = int_to_ptr.vmem [resolvable:$true] %s65_s24 }
  0x28   :  { %p4252_p3 = scmp.lt.u32.totalorder %s4248_s29, %s5026_s8 }
  0x2a   :  { %p4254_p4 = pnand %p4252_p3, %p4249_p2 }
  0x2c   :  { %4257 = shalt.err (!%p4254_p4)
}
  0x2d   :  { %s4258_s20 = scalar_lea.vmem %s66_s24, 8192  ;;  %p4263_p6 = scmp.lt.s32.totalorder %s66_s24, %s66_s24 }
  0x2e   :  { %p4259_p5 = scmp.ne.s32.totalorder %s66_s24, %s4258_s20  ;;  %p4264_p7 = scmp.lt.s32.totalorder %s4258_s20, %s4258_s20 }
  0x30   :  { %p4265_p8 = por %p4264_p7, %p4263_p6 }
  0x32   :  { %p4266_p9 = pnand %p4265_p8, %p4259_p5 }
  0x34   :  { %4269 = shalt.err (!%p4266_p9)
}
  0x35   :  { %s4303_s2 = smov 128   ;;  %s4304_s18 = smov 8  }
  0x36   :  { %71 = dma.hbm_to_vmem [thread:$0]  %s5026_s8, 8192, %s66_s24, [#allocation6], %s4303_s2, %s4303_s2, %s4304_s18  }
  0x37   :  { %s4305_s21 = smov [#allocation8]   ;;  %s4270_s16 = scalar_lea.hbm %s5028_s10, 2048 }
  0x38   :  { %s79_s22 = sshll.u32 %s4305_s21, 4  ;;  %p4271_p10 = scmp.ne.s32.totalorder %s5028_s10, %s4270_s16  ;;  %s80_s22 = int_to_ptr.vmem [resolvable:$true] %s79_s22 }
  0x39   :  { %p4274_p11 = scmp.lt.u32.totalorder %s4270_s16, %s5028_s10 }
  0x3b   :  { %p4276_p12 = pnand %p4274_p11, %p4271_p10 }
  0x3d   :  { %4279 = shalt.err (!%p4276_p12)
}
  0x3e   :  { %s4280_s30 = scalar_lea.vmem %s80_s22, 2048  ;;  %p4285_p0 = scmp.lt.s32.totalorder %s80_s22, %s80_s22 }
  0x3f   :  { %p4281_p13 = scmp.ne.s32.totalorder %s80_s22, %s4280_s30  ;;  %p4286_p1 = scmp.lt.s32.totalorder %s4280_s30, %s4280_s30 }
  0x41   :  { %p4287_p2 = por %p4286_p1, %p4285_p0 }
  0x43   :  { %p4288_p3 = pnand %p4287_p2, %p4281_p13 }
  0x45   :  { %4291 = shalt.err (!%p4288_p3)
}
  0x46   :  { %s4306_s8 = smov 64   ;;  %s4307_s24 = smov 4  }
  0x47   :  { %85 = dma.hbm_to_vmem [thread:$0]  %s5028_s10, 2048, %s80_s22, [#allocation9], %s4306_s8, %s4306_s8, %s4307_s24  }
  0x48   :  { %4292 = dma.done.wait [#allocation4], 2048  }
  0x49   :  { %4293 = vsyncadd [#allocation4], 4294965248 }
  0x4a   :  { %4294 = dma.done.wait [#allocation6], 12288  }
  0x4b   :  { %4295 = vsyncadd [#allocation6], 4294955008 }
  0x4c   :  { %4296 = dma.done.wait [#allocation9], 2048  }
  0x4d   :  { %4297 = vsyncadd [#allocation9], 4294965248  ;;  %v5033_v1 = vmov 0.0   ;;  %v4309_v2 = vmov 0   ;;  %v4448_v3 = vld [vmem:[#allocation3 + $0x4] ss:$16 sps:$4 sm:$0xff]   ;;  %v162_v28 = vlaneseq }
  0x4e   :  { %343 = vmatprep.mubr.f32.mxu0 %v5033_v1  ;;  %414 = vmatprep.mubr.f32.mxu1 %v5033_v1  ;;  %v4450_v4 = vld [vmem:[#allocation3 + $0xc] ss:$16 sps:$4 sm:$0xff]   ;;  %v4453_v5 = vld [vmem:[#allocation3] ss:$16 sps:$4 sm:$0xff]   ;;  %v4455_v6 = vld [vmem:[#allocation3 + $0x8] ss:$16 sps:$4 sm:$0xff]  }
  0x4f   :  { %3875 = vset.pattern.permute.xlu1 %v4309_v2  ;;  %3873 = vset.pattern.permute.xlu0 %v4309_v2  ;;  %v4458_v7 = vld [vmem:[#allocation3 + $0x24] ss:$16 sps:$4 sm:$0xff]   ;;  %v4462_v8 = vld [vmem:[#allocation3 + $0x2c] ss:$16 sps:$4 sm:$0xff]   ;;  %v4464_v9 = vld [vmem:[#allocation3 + $0x20] ss:$16 sps:$4 sm:$0xff]  }
  0x50   :  { %3127 = vmatprep.subr.bf16.mxu0 %v4448_v3  ;;  %3143 = vmatprep.subr.bf16.mxu1 %v4450_v4  ;;  %v4467_v10 = vld [vmem:[#allocation3 + $0x28] ss:$16 sps:$4 sm:$0xff]   ;;  %v4470_v11 = vld [vmem:[#allocation3 + $0x44] ss:$16 sps:$4 sm:$0xff]   ;;  %v4472_v12 = vld [vmem:[#allocation3 + $0x4c] ss:$16 sps:$4 sm:$0xff]  }
  0x51   :  { %3129 = vmatpush1.bf16.msra.mxu0 %v4453_v5  ;;  %3145 = vmatpush1.bf16.msra.mxu1 %v4455_v6  ;;  %v4474_v13 = vld [vmem:[#allocation3 + $0x40] ss:$16 sps:$4 sm:$0xff]   ;;  %v4476_v14 = vld [vmem:[#allocation3 + $0x48] ss:$16 sps:$4 sm:$0xff]   ;;  %v4480_v15 = vld [vmem:[#allocation3 + $0x64] ss:$16 sps:$4 sm:$0xff]  }
  0x52   :  { %3131 = vmatprep.subr.bf16.mxu0 %v4458_v7  ;;  %3147 = vmatprep.subr.bf16.mxu1 %v4462_v8  ;;  %v4484_v16 = vld [vmem:[#allocation3 + $0x6c] ss:$16 sps:$4 sm:$0xff]   ;;  %v4494_v19 = vld [vmem:[#allocation3 + $0x60] ss:$16 sps:$4 sm:$0xff]   ;;  %v4496_v20 = vld [vmem:[#allocation3 + $0x68] ss:$16 sps:$4 sm:$0xff]  }
  0x53   :  { %v2876_v17 = vld [vmem:[%s5018_s0 + $0x8] sm:$0xff]  ;;  %v155_v18 = vld [vmem:[%s5018_s0] sm:$0xff]  ;;  %v4310_v21 = vmov 1   ;;  %v2882_v22 = vld [vmem:[%s5018_s0 + $0x10] sm:$0xff]  ;;  %v163_v29 = vshrl.u32 %v162_v28, 7  ;;  %vm275_vm0 = vcmask 523264  }
  0x54   :  { %453 = vperm.xlu1 %3875, %v2876_v17   ;;  %158 = vperm.xlu0 %3873, %v155_v18   ;;  %v2888_v23 = vld [vmem:[%s5018_s0 + $0x18] sm:$0xff]  ;;  %v2894_v24 = vld [vmem:[%s5018_s0 + $0x20] sm:$0xff]  ;;  %v2900_v25 = vld [vmem:[%s5018_s0 + $0x28] sm:$0xff]  ;;  %vm4312_vm1 = vmmov 0   ;;  %vm2864_vm2 = vcmask 7168  }
  0x55   :  { %3133 = vmatpush1.bf16.msra.mxu0 %v4464_v9  ;;  %3149 = vmatpush1.bf16.msra.mxu1 %v4467_v10  ;;  %v2906_v26 = vld [vmem:[%s5018_s0 + $0x30] sm:$0xff]  ;;  %v2912_v27 = vld [vmem:[%s5018_s0 + $0x38] sm:$0xff]  ;;  %v104_v30 = vld [vmem:[%s5019_s1] sm:$0xf]  ;;  %v4545_v31 = vsub.s32 0, %v163_v29  ;;  %v4547_v33 = vsub.s32 1, %v163_v29 }
  0x56   :  { %3135 = vmatprep.subr.bf16.mxu0 %v4470_v11  ;;  %3151 = vmatprep.subr.bf16.mxu1 %v4472_v12  ;;  %v105_v32 = vunpack.c.l.bf16 %v104_v30  ;;  %v4553_v37 = vsub.s32 2, %v163_v29  ;;  %v172_v38 = vsub.s32 4, %v163_v29  ;;  %v176_v40 = vsub.s32 6, %v163_v29  ;;  %v4593_v63 = vld [vmem:[%s5021_s3] sm:$0xf] }
  0x57   :  { %5038 = vst [vmem:[#allocation13_spill] sm:$0xff] %v4545_v31  ;;  %v4557_v41 = vsub.s32 3, %v163_v29  ;;  %v216_v42 = vsub.s32 5, %v163_v29  ;;  %v220_v44 = vsub.s32 7, %v163_v29  ;;  %v4608_v28 = vrot.slane %v4593_v63, %v4545_v31 }
  0x58   :  { %3876 = vset.pattern.permute.xlu1 %v4310_v21  ;;  %3874 = vset.pattern.permute.xlu0 %v4310_v21  ;;  %v165_v35 = vrot.slane %v105_v32, %v4545_v31  ;;  %v209_v36 = vrot.slane %v105_v32, %v4547_v33  ;;  %v169_v47 = vrot.slane %v105_v32, %v4553_v37 }
  0x59   :  { %3137 = vmatpush1.bf16.msra.mxu0 %v4474_v13  ;;  %3153 = vmatpush1.bf16.msra.mxu1 %v4476_v14  ;;  %5039 = vst [vmem:[#allocation14_spill] sm:$0xff] %v4557_v41  ;;  %v173_v48 = vrot.slane %v105_v32, %v172_v38  ;;  %v177_v51 = vrot.slane %v105_v32, %v176_v40 }
  0x5a   :  { %3139 = vmatprep.subr.bf16.mxu0 %v4480_v15  ;;  %3155 = vmatprep.subr.bf16.mxu1 %v4484_v16  ;;  %v4560_v43 = vrot.slane %v165_v35, %v4545_v31  ;;  %v4563_v45 = vrot.slane %v209_v36, %v4547_v33  ;;  %v213_v52 = vrot.slane %v105_v32, %v4557_v41 }
  0x5b   :  { %461 = vperm.xlu1 %3876, %v2876_v17   ;;  %203 = vperm.xlu0 %3874, %v155_v18   ;;  %v217_v53 = vrot.slane %v105_v32, %v216_v42  ;;  %v221_v54 = vrot.slane %v105_v32, %v220_v44  ;;  %v4576_v56 = vrot.slane %v169_v47, %v4545_v31 }
  0x5c   :  { %v4579_v57 = vrot.slane %v173_v48, %v4545_v31  ;;  %v4582_v60 = vrot.slane %v177_v51, %v4545_v31  ;;  %v4585_v61 = vrot.slane %v213_v52, %v4547_v33 }
  0x5d   :  { %3141 = vmatpush1.bf16.msra.mxu0 %v4494_v19  ;;  %3157 = vmatpush1.bf16.msra.mxu1 %v4496_v20  ;;  %v4588_v62 = vrot.slane %v217_v53, %v4547_v33  ;;  %v4596_v0 = vrot.slane %v221_v54, %v4547_v33 }
  0x5e   :  { %3159 = vmatprep.subr.bf16.mxu0 %v4448_v3  ;;  %3175 = vmatprep.subr.bf16.mxu1 %v4450_v4 }
  0x5f   :  { %3877 = vset.pattern.permute.xlu1 %v4309_v2  ;;  %661 = vperm.xlu0 %3874, %v2882_v22  }
  0x60   :  { %344 = vmatmul.mubr.f32.vlgmr.msra.gmra.mrb[0].mxu0 %v5033_v1  ;;  %415 = vmatmul.mubr.f32.vlgmr.msra.gmra.mrb[0].mxu1 %v5033_v1 }
  0x61   :  { %653 = vperm.xlu1 %3877, %v2882_v22   ;;  %3161 = vmatpush1.bf16.msra.mxu0 %v4453_v5 }
  0x62   :  { %3177 = vmatpush1.bf16.msra.mxu1 %v4455_v6  ;;  %3163 = vmatprep.subr.bf16.mxu0 %v4458_v7 }
  0x63   :  { %3179 = vmatprep.subr.bf16.mxu1 %v4462_v8  ;;  %543 = vmatprep.mubr.f32.mxu0 %v5033_v1 }
  0x64   :  { %614 = vmatprep.mubr.f32.mxu1 %v5033_v1  ;;  %861 = vperm.xlu0 %3874, %v2888_v23  }
  0x65   :  { %853 = vperm.xlu1 %3877, %v2888_v23   ;;  %3165 = vmatpush1.bf16.msra.mxu0 %v4464_v9 }
  0x66   :  { %3181 = vmatpush1.bf16.msra.mxu1 %v4467_v10  ;;  %3167 = vmatprep.subr.bf16.mxu0 %v4470_v11 }
  0x67   :  { %3183 = vmatprep.subr.bf16.mxu1 %v4472_v12 }
  0x68   :  { %1061 = vperm.xlu0 %3874, %v2894_v24  }
  0x69   :  { %1053 = vperm.xlu1 %3877, %v2894_v24   ;;  %3169 = vmatpush1.bf16.msra.mxu0 %v4474_v13 }
  0x6a   :  { %3185 = vmatpush1.bf16.msra.mxu1 %v4476_v14  ;;  %3171 = vmatprep.subr.bf16.mxu0 %v4480_v15 }
  0x6b   :  { %3187 = vmatprep.subr.bf16.mxu1 %v4484_v16 }
  0x6c   :  { %1261 = vperm.xlu0 %3874, %v2900_v25  }
  0x6d   :  { %1253 = vperm.xlu1 %3877, %v2900_v25   ;;  %3173 = vmatpush1.bf16.msra.mxu0 %v4494_v19 }
  0x6e   :  { %3189 = vmatpush1.bf16.msra.mxu1 %v4496_v20  ;;  %3191 = vmatprep.subr.bf16.mxu0 %v4448_v3 }
  0x6f   :  { %3207 = vmatprep.subr.bf16.mxu1 %v4450_v4 }
  0x70   :  { %1461 = vperm.xlu0 %3874, %v2906_v26  }
  0x71   :  { %1453 = vperm.xlu1 %3877, %v2906_v26  }
  0x74   :  { %1661 = vperm.xlu0 %3874, %v2912_v27  }
  0x75   :  { %1653 = vperm.xlu1 %3877, %v2912_v27  }
  0xd3   :  { %v4549_v34 = vpop.permute.xlu1 %453  ;;  %v4555_v39 = vpop.permute.xlu0 %158 }
  0xd4   :  { %v456_v49 = vmul.f32 %v4549_v34, %v4560_v43 }
  0xda   :  { %v4565_v46 = vpop.permute.xlu1 %461  ;;  %v4573_v55 = vpop.permute.xlu0 %203 }
  0xdb   :  { %v464_v50 = vmul.f32 %v4565_v46, %v4563_v45 }
  0xdd   :  { %v468_v59 = vadd.f32 %v464_v50, %v456_v49 }
  0xde   :  { %v662_v21 = vpop.permute.xlu0 %661 }
  0xdf   :  { %v664_v22 = vmul.f32 %v662_v21, %v4563_v45  ;;  %v665_v23 = vmul.f32 %v662_v21, %v4585_v61  ;;  %v666_v24 = vmul.f32 %v662_v21, %v4588_v62  ;;  %v667_v26 = vmul.f32 %v662_v21, %v4596_v0 }
  0xe0   :  { %v654_v58 = vpop.permute.xlu1 %653  ;;  %v4614_v36 = vadd.f32 %v468_v59, %v4608_v28 }
  0xe1   :  { %v656_v2 = vmul.f32 %v654_v58, %v4560_v43  ;;  %v657_v17 = vmul.f32 %v654_v58, %v4576_v56  ;;  %v658_v18 = vmul.f32 %v654_v58, %v4579_v57  ;;  %v659_v25 = vmul.f32 %v654_v58, %v4582_v60 }
  0xe3   :  { %v862_v35 = vpop.permute.xlu0 %861  ;;  %v668_v38 = vadd.f32 %v664_v22, %v656_v2  ;;  %v4616_v40 = vadd.f32 %v666_v24, %v658_v18  ;;  %v4618_v42 = vadd.f32 %v665_v23, %v657_v17  ;;  %v4628_v53 = vadd.f32 %v667_v26, %v659_v25 }
  0xe4   :  { %v854_v27 = vpop.permute.xlu1 %853  ;;  %v864_v44 = vmul.f32 %v862_v35, %v4563_v45  ;;  %v865_v47 = vmul.f32 %v862_v35, %v4585_v61  ;;  %v866_v48 = vmul.f32 %v862_v35, %v4588_v62  ;;  %v867_v50 = vmul.f32 %v862_v35, %v4596_v0 }
  0xe5   :  { %v856_v29 = vmul.f32 %v854_v27, %v4560_v43  ;;  %v857_v30 = vmul.f32 %v854_v27, %v4576_v56  ;;  %v858_v32 = vmul.f32 %v854_v27, %v4579_v57  ;;  %v859_v49 = vmul.f32 %v854_v27, %v4582_v60 }
  0xe6   :  { %v4626_v52 = vadd.f32 %v668_v38, %v4608_v28 }
  0xe7   :  { %v1062_v2 = vpop.permute.xlu0 %1061  ;;  %v868_v17 = vadd.f32 %v864_v44, %v856_v29  ;;  %v4633_v18 = vadd.f32 %v866_v48, %v858_v32  ;;  %v4635_v21 = vadd.f32 %v865_v47, %v857_v30  ;;  %v4645_v38 = vadd.f32 %v867_v50, %v859_v49 }
  0xe8   :  { %v1054_v51 = vpop.permute.xlu1 %1053  ;;  %v1064_v22 = vmul.f32 %v1062_v2, %v4563_v45  ;;  %v1065_v23 = vmul.f32 %v1062_v2, %v4585_v61  ;;  %v1066_v24 = vmul.f32 %v1062_v2, %v4588_v62  ;;  %v1067_v26 = vmul.f32 %v1062_v2, %v4596_v0 }
  0xe9   :  { %v1056_v54 = vmul.f32 %v1054_v51, %v4560_v43  ;;  %v1057_v58 = vmul.f32 %v1054_v51, %v4576_v56  ;;  %v1058_v59 = vmul.f32 %v1054_v51, %v4579_v57  ;;  %v1059_v25 = vmul.f32 %v1054_v51, %v4582_v60  ;;  %5041 = vst [vmem:[#allocation16_spill] sm:$0xff] %v4645_v38 }
  0xea   :  { %v4643_v35 = vadd.f32 %v868_v17, %v4608_v28 }
  0xeb   :  { %v1262_v44 = vpop.permute.xlu0 %1261  ;;  %v1068_v47 = vadd.f32 %v1064_v22, %v1056_v54  ;;  %v4650_v48 = vadd.f32 %v1066_v24, %v1058_v59  ;;  %v4652_v1 = vadd.f32 %v1065_v23, %v1057_v58  ;;  %v4662_v38 = vadd.f32 %v1067_v26, %v1059_v25 }
  0xec   :  { %v1254_v27 = vpop.permute.xlu1 %1253  ;;  %5040 = vst [vmem:[#allocation15_spill] sm:$0xff] %v4643_v35  ;;  %v1264_v51 = vmul.f32 %v1262_v44, %v4563_v45  ;;  %v1265_v2 = vmul.f32 %v1262_v44, %v4585_v61  ;;  %v1266_v17 = vmul.f32 %v1262_v44, %v4588_v62  ;;  %v1267_v50 = vmul.f32 %v1262_v44, %v4596_v0 }
  0xed   :  { %v1256_v29 = vmul.f32 %v1254_v27, %v4560_v43  ;;  %v1257_v30 = vmul.f32 %v1254_v27, %v4576_v56  ;;  %v1258_v32 = vmul.f32 %v1254_v27, %v4579_v57  ;;  %5042 = vst [vmem:[#allocation17_spill] sm:$0xff] %v4650_v48  ;;  %5043 = vst [vmem:[#allocation18_spill] sm:$0xff] %v4652_v1 }
  0xee   :  { %v1259_v49 = vmul.f32 %v1254_v27, %v4582_v60  ;;  %v4660_v35 = vadd.f32 %v1068_v47, %v4608_v28  ;;  %5045 = vst [vmem:[#allocation20_spill] sm:$0xff] %v4662_v38 }
  0xef   :  { %v1462_v22 = vpop.permute.xlu0 %1461  ;;  %v1268_v23 = vadd.f32 %v1264_v51, %v1256_v29  ;;  %v4667_v24 = vadd.f32 %v1266_v17, %v1258_v32  ;;  %v4669_v1 = vadd.f32 %v1265_v2, %v1257_v30 }
  0xf0   :  { %v1454_v31 = vpop.permute.xlu1 %1453  ;;  %5044 = vst [vmem:[#allocation19_spill] sm:$0xff] %v4660_v35  ;;  %v1464_v27 = vmul.f32 %v1462_v22, %v4563_v45  ;;  %v1465_v44 = vmul.f32 %v1462_v22, %v4585_v61  ;;  %v1466_v47 = vmul.f32 %v1462_v22, %v4588_v62  ;;  %v1467_v26 = vmul.f32 %v1462_v22, %v4596_v0 }
  0xf1   :  { %v1456_v54 = vmul.f32 %v1454_v31, %v4560_v43  ;;  %v1457_v58 = vmul.f32 %v1454_v31, %v4576_v56  ;;  %v1458_v59 = vmul.f32 %v1454_v31, %v4579_v57  ;;  %5046 = vst [vmem:[#allocation21_spill] sm:$0xff] %v4667_v24  ;;  %5047 = vst [vmem:[#allocation22_spill] sm:$0xff] %v4669_v1 }
  0xf2   :  { %v1459_v25 = vmul.f32 %v1454_v31, %v4582_v60  ;;  %v4677_v38 = vadd.f32 %v1268_v23, %v4608_v28  ;;  %v4679_v48 = vadd.f32 %v1267_v50, %v1259_v49 }
  0xf3   :  { %v1662_v2 = vpop.permute.xlu0 %1661  ;;  %v1468_v17 = vadd.f32 %v1464_v27, %v1456_v54  ;;  %v4685_v1 = vadd.f32 %v1466_v47, %v1458_v59  ;;  %v4687_v31 = vadd.f32 %v1465_v44, %v1457_v58  ;;  %v198_v27 = vmul.f32 %v4560_v43, %v4555_v39 }
  0xf4   :  { %v1654_v35 = vpop.permute.xlu1 %1653  ;;  %5048 = vst [vmem:[#allocation23_spill] sm:$0xff] %v4677_v38  ;;  %5049 = vst [vmem:[#allocation24_spill] sm:$0xff] %v4679_v48  ;;  %v1664_v22 = vmul.f32 %v1662_v2, %v4563_v45  ;;  %v1665_v23 = vmul.f32 %v1662_v2, %v4585_v61  ;;  %v1666_v49 = vmul.f32 %v1662_v2, %v4588_v62 }
  0xf5   :  { %v1656_v29 = vmul.f32 %v1654_v35, %v4560_v43  ;;  %v1657_v30 = vmul.f32 %v1654_v35, %v4576_v56  ;;  %v1658_v32 = vmul.f32 %v1654_v35, %v4579_v57  ;;  %v1659_v51 = vmul.f32 %v1654_v35, %v4582_v60 }
  0xf6   :  { %v1667_v50 = vmul.f32 %v1662_v2, %v4596_v0  ;;  %v4694_v38 = vadd.f32 %v1468_v17, %v4608_v28  ;;  %v4696_v48 = vadd.f32 %v1467_v26, %v1459_v25  ;;  %v242_v44 = vmul.f32 %v4563_v45, %v4573_v55 }
  0xf7   :  { %v1668_v35 = vadd.f32 %v1664_v22, %v1656_v29  ;;  %v4698_v24 = vadd.f32 %v1666_v49, %v1658_v32  ;;  %v4700_v54 = vadd.f32 %v1665_v23, %v1657_v30  ;;  %v199_v47 = vmul.f32 %v4576_v56, %v4555_v39 }
  0xf8   :  { %v4702_v58 = vadd.f32 %v1667_v50, %v1659_v51  ;;  %v243_v25 = vmul.f32 %v4585_v61, %v4573_v55  ;;  %v246_v26 = vadd.f32 %v242_v44, %v198_v27  ;;  %v4717_v30 = vrot.slane %v4593_v63, %v4547_v33 }
  0xf9   :  { %v4705_v59 = vadd.f32 %v1668_v35, %v4608_v28  ;;  %v201_v32 = vmul.f32 %v4582_v60, %v4555_v39  ;;  %v245_v43 = vmul.f32 %v4596_v0, %v4573_v55  ;;  %v4727_v27 = vrot.slane %v4593_v63, %v4557_v41 }
  0xfa   :  { %v247_v29 = vadd.f32 %v243_v25, %v199_v47  ;;  %v271_v45 = vadd.f32 %v4608_v28, %v246_v26  ;;  %v200_v44 = vmul.f32 %v4579_v57, %v4555_v39  ;;  %v244_v47 = vmul.f32 %v4588_v62, %v4573_v55 }
  0xfb   :  { %v249_v35 = vadd.f32 %v245_v43, %v201_v32  ;;  %v4736_v32 = vrot.slane %v4593_v63, %v4553_v37 }
  0xfc   :  { %v272_v17 = vadd.f32 %v4717_v30, %v247_v29  ;;  %v248_v29 = vadd.f32 %v244_v47, %v200_v44 }
  0xfd   :  { %v274_v26 = vadd.f32 %v4727_v27, %v249_v35 }
 0x133   :  { %v345_v51 = vpop.f32.mrb[0].mxu0  ;;  %v416_v2 = vpop.f32.mrb[0].mxu1 }
 0x134   :  { %v421_v22 = vadd.f32 %v345_v51, %v271_v45  ;;  %v347_v23 = vpop.f32.mrb[1].mxu0  ;;  %v418_v49 = vpop.f32.mrb[1].mxu1  ;;  %v273_v45 = vadd.f32 %v4736_v32, %v248_v29  ;;  %v457_v29 = vmul.f32 %v4549_v34, %v4576_v56 }
 0x135   :  { %v422_v50 = vadd.f32 %v347_v23, %v272_v17  ;;  %v424_v43 = vadd.f32 %v418_v49, %v274_v26 }
 0x136   :  { %v2873_v28 = vmul.f32 -1.442695, %v421_v22  ;;  %v423_v17 = vadd.f32 %v416_v2, %v273_v45  ;;  %v459_v45 = vmul.f32 %v4549_v34, %v4582_v60 }
 0x137   :  { %v2874_v25 = vmul.f32 -1.442695, %v422_v50  ;;  %v2875_v51 = vmul.f32 -1.442695, %v424_v43  ;;  %v458_v43 = vmul.f32 %v4549_v34, %v4579_v57 }
 0x138   :  { %4046 = vpow2.f32 %v2873_v28 }
 0x139   :  { %4048 = vpow2.f32 %v2874_v25 }
 0x13a   :  { %4050 = vpow2.f32 %v2875_v51  ;;  %v465_v51 = vmul.f32 %v4565_v46, %v4585_v61 }
 0x13b   :  { %4052 = vtanh.f32 %v423_v17  ;;  %v466_v17 = vmul.f32 %v4565_v46, %v4588_v62 }
 0x142   :  { %v4047_v39 = vpop.eup %4046 }
 0x143   :  { %v4049_v23 = vpop.eup %4048  ;;  %v428_v41 = vadd.f32 1.0, %v4047_v39  ;;  %v467_v39 = vmul.f32 %v4565_v46, %v4596_v0 }
 0x144   :  { %v434_v55 = vadd.f32 1.0, %v4049_v23  ;;  %v4051_v22 = vpop.eup %4050  ;;  %v470_v23 = vadd.f32 %v466_v17, %v458_v43 }
 0x145   :  { %4054 = vrcp.f32 %v428_v41  ;;  %v4053_v50 = vpop.eup %4052  ;;  %v441_v63 = vadd.f32 1.0, %v4051_v22  ;;  %v5050_v41 = vmov 0.0   ;;  %v471_v22 = vadd.f32 %v467_v39, %v459_v45 }
 0x146   :  { %4056 = vrcp.f32 %v434_v55  ;;  %v469_v55 = vadd.f32 %v465_v51, %v457_v29  ;;  %v474_v56 = vadd.f32 %v470_v23, %v4736_v32 }
 0x147   :  { %4058 = vrcp.f32 %v441_v63  ;;  %v475_v34 = vadd.f32 %v471_v22, %v4727_v27 }
 0x148   :  { %v473_v57 = vadd.f32 %v469_v55, %v4717_v30 }
 0x14f   :  { %v4055_v35 = vpop.eup %4054 }
 0x150   :  { %v4057_v44 = vpop.eup %4056  ;;  %v445_v47 = vmul.f32 %v4055_v35, %v4053_v50 }
 0x151   :  { %v444_v28 = vmul.f32 0.0, %v4057_v44  ;;  %v4059_v2 = vpop.eup %4058 }
 0x153   :  { %v4739_v49 = vadd.f32 %v445_v47, %v444_v28 }
 0x155   :  { %4060 = vtanh.f32 %v4739_v49 }
 0x15f   :  { %v4061_v25 = vpop.eup %4060 }
 0x160   :  { %v448_v26 = vmul.f32 %v4061_v25, %v4059_v2 }
 0x162   :  { %2877 = vmatmul.mubr.msk.f32.vlgmr.msra.gmra.mrb[2].mxu0 %vm275_vm0, %v448_v26  ;;  %2878 = vmatmul.mubr.msk.f32.vlgmr.msra.gmra.mrb[2].mxu1 %vm275_vm0, %v448_v26 }
 0x163   :  { %3193 = vmatpush1.bf16.msra.mxu0 %v4453_v5  ;;  %3209 = vmatpush1.bf16.msra.mxu1 %v4455_v6 }
 0x164   :  { %3195 = vmatprep.subr.bf16.mxu0 %v4458_v7  ;;  %3211 = vmatprep.subr.bf16.mxu1 %v4462_v8 }
 0x165   :  { %743 = vmatprep.mubr.f32.mxu0 %v5050_v41  ;;  %814 = vmatprep.mubr.f32.mxu1 %v5050_v41 }
 0x167   :  { %3197 = vmatpush1.bf16.msra.mxu0 %v4464_v9  ;;  %3213 = vmatpush1.bf16.msra.mxu1 %v4467_v10 }
 0x168   :  { %3199 = vmatprep.subr.bf16.mxu0 %v4470_v11  ;;  %3215 = vmatprep.subr.bf16.mxu1 %v4472_v12 }
 0x16b   :  { %3201 = vmatpush1.bf16.msra.mxu0 %v4474_v13  ;;  %3217 = vmatpush1.bf16.msra.mxu1 %v4476_v14 }
 0x16c   :  { %3203 = vmatprep.subr.bf16.mxu0 %v4480_v15  ;;  %3219 = vmatprep.subr.bf16.mxu1 %v4484_v16 }
 0x16f   :  { %3205 = vmatpush1.bf16.msra.mxu0 %v4494_v19  ;;  %3221 = vmatpush1.bf16.msra.mxu1 %v4496_v20 }
 0x170   :  { %3223 = vmatprep.subr.bf16.mxu0 %v4448_v3  ;;  %3239 = vmatprep.subr.bf16.mxu1 %v4450_v4 }
 0x235   :  { %v545_v50 = vpop.f32.mrb[2].mxu0  ;;  %v616_v35 = vpop.f32.mrb[2].mxu1 }
 0x236   :  { %v621_v60 = vadd.f32 %v545_v50, %v4614_v36  ;;  %v623_v61 = vadd.f32 %v616_v35, %v474_v56  ;;  %v547_v44 = vpop.f32.mrb[3].mxu0  ;;  %v618_v47 = vpop.f32.mrb[3].mxu1 }
 0x237   :  { %v622_v62 = vadd.f32 %v547_v44, %v473_v57  ;;  %v624_v63 = vadd.f32 %v618_v47, %v475_v34  ;;  %v673_v34 = vadd.f32 %v4618_v42, %v4717_v30 }
 0x238   :  { %v2879_v28 = vmul.f32 -1.442695, %v621_v60  ;;  %v675_v60 = vadd.f32 %v4628_v53, %v4727_v27 }
 0x239   :  { %v2880_v46 = vmul.f32 -1.442695, %v622_v62  ;;  %v2881_v0 = vmul.f32 -1.442695, %v624_v63 }
 0x23a   :  { %4062 = vpow2.f32 %v2879_v28 }
 0x23b   :  { %4064 = vpow2.f32 %v2880_v46 }
 0x23c   :  { %4066 = vpow2.f32 %v2881_v0 }
 0x23d   :  { %4068 = vtanh.f32 %v623_v61 }
 0x244   :  { %v4063_v2 = vpop.eup %4062 }
 0x245   :  { %v4065_v25 = vpop.eup %4064  ;;  %v628_v26 = vadd.f32 1.0, %v4063_v2 }
 0x246   :  { %v634_v29 = vadd.f32 1.0, %v4065_v25  ;;  %v4067_v43 = vpop.eup %4066 }
 0x247   :  { %4070 = vrcp.f32 %v628_v26  ;;  %v4069_v36 = vpop.eup %4068  ;;  %v641_v39 = vadd.f32 1.0, %v4067_v43 }
 0x248   :  { %4072 = vrcp.f32 %v634_v29 }
 0x249   :  { %4074 = vrcp.f32 %v641_v39 }
 0x251   :  { %v4071_v45 = vpop.eup %4070 }
 0x252   :  { %v4073_v51 = vpop.eup %4072  ;;  %v645_v17 = vmul.f32 %v4071_v45, %v4069_v36 }
 0x253   :  { %v644_v23 = vmul.f32 %v4073_v51, %v4739_v49  ;;  %v4075_v22 = vpop.eup %4074  ;;  %v674_v49 = vadd.f32 %v4616_v40, %v4736_v32 }
 0x255   :  { %v646_v55 = vadd.f32 %v645_v17, %v644_v23 }
 0x257   :  { %4076 = vtanh.f32 %v646_v55 }
 0x261   :  { %v4077_v56 = vpop.eup %4076 }
 0x262   :  { %v648_v50 = vmul.f32 %v4077_v56, %v4075_v22 }
 0x264   :  { %2883 = vmatmul.mubr.msk.f32.vlgmr.msra.gmra.mrb[4].mxu0 %vm275_vm0, %v648_v50  ;;  %2884 = vmatmul.mubr.msk.f32.vlgmr.msra.gmra.mrb[4].mxu1 %vm275_vm0, %v648_v50 }
 0x265   :  { %3225 = vmatpush1.bf16.msra.mxu0 %v4453_v5  ;;  %3241 = vmatpush1.bf16.msra.mxu1 %v4455_v6 }
 0x266   :  { %3227 = vmatprep.subr.bf16.mxu0 %v4458_v7  ;;  %3243 = vmatprep.subr.bf16.mxu1 %v4462_v8 }
 0x267   :  { %943 = vmatprep.mubr.f32.mxu0 %v5050_v41  ;;  %1014 = vmatprep.mubr.f32.mxu1 %v5050_v41 }
 0x269   :  { %3229 = vmatpush1.bf16.msra.mxu0 %v4464_v9  ;;  %3245 = vmatpush1.bf16.msra.mxu1 %v4467_v10 }
 0x26a   :  { %3231 = vmatprep.subr.bf16.mxu0 %v4470_v11  ;;  %3247 = vmatprep.subr.bf16.mxu1 %v4472_v12 }
 0x26d   :  { %3233 = vmatpush1.bf16.msra.mxu0 %v4474_v13  ;;  %3249 = vmatpush1.bf16.msra.mxu1 %v4476_v14 }
 0x26e   :  { %3235 = vmatprep.subr.bf16.mxu0 %v4480_v15  ;;  %3251 = vmatprep.subr.bf16.mxu1 %v4484_v16 }
 0x271   :  { %3237 = vmatpush1.bf16.msra.mxu0 %v4494_v19  ;;  %3253 = vmatpush1.bf16.msra.mxu1 %v4496_v20 }
 0x272   :  { %3255 = vmatprep.subr.bf16.mxu0 %v4448_v3  ;;  %3271 = vmatprep.subr.bf16.mxu1 %v4450_v4 }
 0x337   :  { %v745_v35 = vpop.f32.mrb[4].mxu0  ;;  %v816_v57 = vpop.f32.mrb[4].mxu1 }
 0x338   :  { %v821_v61 = vadd.f32 %v745_v35, %v4626_v52  ;;  %v823_v44 = vadd.f32 %v816_v57, %v674_v49  ;;  %v747_v47 = vpop.f32.mrb[5].mxu0  ;;  %v818_v62 = vpop.f32.mrb[5].mxu1 }
 0x339   :  { %v822_v63 = vadd.f32 %v747_v47, %v673_v34  ;;  %v824_v3 = vadd.f32 %v818_v62, %v675_v60 }
 0x33a   :  { %v2885_v28 = vmul.f32 -1.442695, %v821_v61 }
 0x33b   :  { %v2886_v4 = vmul.f32 -1.442695, %v822_v63  ;;  %v2887_v40 = vmul.f32 -1.442695, %v824_v3 }
 0x33c   :  { %4078 = vpow2.f32 %v2885_v28 }
 0x33d   :  { %4080 = vpow2.f32 %v2886_v4  ;;  %v4842_v4 = vld [vmem:[#allocation3] ss:$16 sps:$4 sm:$0xff]  }
 0x33e   :  { %4082 = vpow2.f32 %v2887_v40  ;;  %v4845_v40 = vld [vmem:[#allocation3 + $0x8] ss:$16 sps:$4 sm:$0xff]  }
 0x33f   :  { %4084 = vtanh.f32 %v823_v44 }
 0x346   :  { %v4079_v46 = vpop.eup %4078 }
 0x347   :  { %v4081_v0 = vpop.eup %4080  ;;  %v828_v2 = vadd.f32 1.0, %v4079_v46  ;;  %v4848_v46 = vld [vmem:[#allocation3 + $0x24] ss:$16 sps:$4 sm:$0xff]  }
 0x348   :  { %v834_v42 = vadd.f32 1.0, %v4081_v0  ;;  %v4083_v53 = vpop.eup %4082  ;;  %v4851_v0 = vld [vmem:[#allocation3 + $0x2c] ss:$16 sps:$4 sm:$0xff]  }
 0x349   :  { %4086 = vrcp.f32 %v828_v2  ;;  %v4085_v52 = vpop.eup %4084  ;;  %v841_v43 = vadd.f32 1.0, %v4083_v53  ;;  %v4856_v2 = vld [vmem:[#allocation3 + $0x20] ss:$16 sps:$4 sm:$0xff]   ;;  %v4862_v53 = vld [vmem:[#allocation3 + $0x44] ss:$16 sps:$4 sm:$0xff]  }
 0x34a   :  { %4088 = vrcp.f32 %v834_v42  ;;  %v4859_v42 = vld [vmem:[#allocation3 + $0x28] ss:$16 sps:$4 sm:$0xff]  }
 0x34b   :  { %4090 = vrcp.f32 %v841_v43  ;;  %v4877_v43 = vld [vmem:[#allocation3 + $0x6c] ss:$16 sps:$4 sm:$0xff]  }
 0x353   :  { %v4087_v25 = vpop.eup %4086 }
 0x354   :  { %v4089_v26 = vpop.eup %4088  ;;  %v845_v29 = vmul.f32 %v4087_v25, %v4085_v52  ;;  %v4865_v52 = vld [vmem:[#allocation3 + $0x4c] ss:$16 sps:$4 sm:$0xff]   ;;  %v4868_v25 = vld [vmem:[#allocation3 + $0x40] ss:$16 sps:$4 sm:$0xff]  }
 0x355   :  { %v844_v36 = vmul.f32 %v4089_v26, %v646_v55  ;;  %v4091_v51 = vpop.eup %4090  ;;  %v4871_v26 = vld [vmem:[#allocation3 + $0x48] ss:$16 sps:$4 sm:$0xff]  }
 0x357   :  { %v846_v45 = vadd.f32 %v845_v29, %v844_v36  ;;  %v4874_v29 = vld [vmem:[#allocation3 + $0x64] ss:$16 sps:$4 sm:$0xff]   ;;  %v4880_v36 = vld [vmem:[#allocation3 + $0x60] ss:$16 sps:$4 sm:$0xff]  }
 0x359   :  { %4092 = vtanh.f32 %v846_v45 }
 0x363   :  { %v4093_v17 = vpop.eup %4092 }
 0x364   :  { %v848_v39 = vmul.f32 %v4093_v17, %v4091_v51  ;;  %v5053_v51 = vld [vmem:[#allocation17_spill] sm:$0xff] }
 0x365   :  { %v1074_v17 = vadd.f32 %v5053_v51, %v4736_v32 }
 0x366   :  { %2889 = vmatmul.mubr.msk.f32.vlgmr.msra.gmra.mrb[6].mxu0 %vm275_vm0, %v848_v39  ;;  %2890 = vmatmul.mubr.msk.f32.vlgmr.msra.gmra.mrb[6].mxu1 %vm275_vm0, %v848_v39 }
 0x367   :  { %3257 = vmatpush1.bf16.msra.mxu0 %v4453_v5  ;;  %3273 = vmatpush1.bf16.msra.mxu1 %v4455_v6  ;;  %v4824_v5 = vld [vmem:[#allocation3 + $0x4] ss:$16 sps:$4 sm:$0xff]   ;;  %v4827_v6 = vld [vmem:[#allocation3 + $0xc] ss:$16 sps:$4 sm:$0xff]  }
 0x368   :  { %3259 = vmatprep.subr.bf16.mxu0 %v4458_v7  ;;  %3275 = vmatprep.subr.bf16.mxu1 %v4462_v8  ;;  %v874_v7 = vadd.f32 %v4633_v18, %v4736_v32 }
 0x369   :  { %1143 = vmatprep.mubr.f32.mxu0 %v5050_v41  ;;  %1214 = vmatprep.mubr.f32.mxu1 %v5050_v41 }
 0x36b   :  { %3261 = vmatpush1.bf16.msra.mxu0 %v4464_v9  ;;  %3277 = vmatpush1.bf16.msra.mxu1 %v4467_v10  ;;  %v873_v10 = vadd.f32 %v4635_v21, %v4717_v30 }
 0x36c   :  { %3263 = vmatprep.subr.bf16.mxu0 %v4470_v11  ;;  %3279 = vmatprep.subr.bf16.mxu1 %v4472_v12  ;;  %v5051_v11 = vld [vmem:[#allocation16_spill] sm:$0xff] }
 0x36d   :  { %v875_v12 = vadd.f32 %v5051_v11, %v4727_v27 }
 0x36f   :  { %3265 = vmatpush1.bf16.msra.mxu0 %v4474_v13  ;;  %3281 = vmatpush1.bf16.msra.mxu1 %v4476_v14  ;;  %v5052_v13 = vld [vmem:[#allocation15_spill] sm:$0xff] }
 0x370   :  { %3267 = vmatprep.subr.bf16.mxu0 %v4480_v15  ;;  %3283 = vmatprep.subr.bf16.mxu1 %v4484_v16 }
 0x373   :  { %3269 = vmatpush1.bf16.msra.mxu0 %v4494_v19  ;;  %3285 = vmatpush1.bf16.msra.mxu1 %v4496_v20 }
 0x374   :  { %3287 = vmatprep.subr.bf16.mxu0 %v4824_v5  ;;  %3303 = vmatprep.subr.bf16.mxu1 %v4827_v6 }
 0x439   :  { %v945_v8 = vpop.f32.mrb[6].mxu0  ;;  %v1016_v9 = vpop.f32.mrb[6].mxu1 }
 0x43a   :  { %v1021_v14 = vadd.f32 %v945_v8, %v5052_v13  ;;  %v1023_v15 = vadd.f32 %v1016_v9, %v874_v7  ;;  %v947_v16 = vpop.f32.mrb[7].mxu0  ;;  %v1018_v19 = vpop.f32.mrb[7].mxu1  ;;  %v5054_v8 = vld [vmem:[#allocation18_spill] sm:$0xff] }
 0x43b   :  { %v1022_v20 = vadd.f32 %v947_v16, %v873_v10  ;;  %v1024_v23 = vadd.f32 %v1018_v19, %v875_v12  ;;  %v1073_v9 = vadd.f32 %v5054_v8, %v4717_v30  ;;  %v5055_v10 = vld [vmem:[#allocation20_spill] sm:$0xff]  ;;  %v5056_v12 = vld [vmem:[#allocation19_spill] sm:$0xff] }
 0x43c   :  { %v2891_v55 = vmul.f32 -1.442695, %v1021_v14  ;;  %v1075_v11 = vadd.f32 %v5055_v10, %v4727_v27 }
 0x43d   :  { %v2892_v22 = vmul.f32 -1.442695, %v1022_v20  ;;  %v2893_v18 = vmul.f32 -1.442695, %v1024_v23 }
 0x43e   :  { %4094 = vpow2.f32 %v2891_v55 }
 0x43f   :  { %4096 = vpow2.f32 %v2892_v22 }
 0x440   :  { %4098 = vpow2.f32 %v2893_v18 }
 0x441   :  { %4100 = vtanh.f32 %v1023_v15 }
 0x448   :  { %v4095_v56 = vpop.eup %4094 }
 0x449   :  { %v4097_v50 = vpop.eup %4096  ;;  %v1028_v49 = vadd.f32 1.0, %v4095_v56 }
 0x44a   :  { %v1034_v21 = vadd.f32 1.0, %v4097_v50  ;;  %v4099_v35 = vpop.eup %4098 }
 0x44b   :  { %4102 = vrcp.f32 %v1028_v49  ;;  %v4101_v57 = vpop.eup %4100  ;;  %v1041_v44 = vadd.f32 1.0, %v4099_v35 }
 0x44c   :  { %4104 = vrcp.f32 %v1034_v21 }
 0x44d   :  { %4106 = vrcp.f32 %v1041_v44 }
 0x455   :  { %v4103_v34 = vpop.eup %4102 }
 0x456   :  { %v4105_v60 = vpop.eup %4104  ;;  %v1045_v61 = vmul.f32 %v4103_v34, %v4101_v57 }
 0x457   :  { %v1044_v47 = vmul.f32 %v4105_v60, %v846_v45  ;;  %v4107_v63 = vpop.eup %4106  ;;  %v4883_v45 = vld [vmem:[#allocation3 + $0x68] ss:$16 sps:$4 sm:$0xff]  }
 0x459   :  { %v4837_v62 = vadd.f32 %v1045_v61, %v1044_v47 }
 0x45b   :  { %4108 = vtanh.f32 %v4837_v62 }
 0x465   :  { %v4109_v3 = vpop.eup %4108 }
 0x466   :  { %v1048_v28 = vmul.f32 %v4109_v3, %v4107_v63 }
 0x468   :  { %2895 = vmatmul.mubr.msk.f32.vlgmr.msra.gmra.mrb[8].mxu0 %vm275_vm0, %v1048_v28  ;;  %2896 = vmatmul.mubr.msk.f32.vlgmr.msra.gmra.mrb[8].mxu1 %vm275_vm0, %v1048_v28 }
 0x469   :  { %3289 = vmatpush1.bf16.msra.mxu0 %v4842_v4  ;;  %3305 = vmatpush1.bf16.msra.mxu1 %v4845_v40 }
 0x46a   :  { %3291 = vmatprep.subr.bf16.mxu0 %v4848_v46  ;;  %3307 = vmatprep.subr.bf16.mxu1 %v4851_v0 }
 0x46b   :  { %1343 = vmatprep.mubr.f32.mxu0 %v5050_v41  ;;  %1414 = vmatprep.mubr.f32.mxu1 %v5050_v41 }
 0x46d   :  { %3293 = vmatpush1.bf16.msra.mxu0 %v4856_v2  ;;  %3309 = vmatpush1.bf16.msra.mxu1 %v4859_v42 }
 0x46e   :  { %3295 = vmatprep.subr.bf16.mxu0 %v4862_v53  ;;  %3311 = vmatprep.subr.bf16.mxu1 %v4865_v52 }
 0x471   :  { %3297 = vmatpush1.bf16.msra.mxu0 %v4868_v25  ;;  %3313 = vmatpush1.bf16.msra.mxu1 %v4871_v26 }
 0x472   :  { %3299 = vmatprep.subr.bf16.mxu0 %v4874_v29  ;;  %3315 = vmatprep.subr.bf16.mxu1 %v4877_v43 }
 0x475   :  { %3301 = vmatpush1.bf16.msra.mxu0 %v4880_v36  ;;  %3317 = vmatpush1.bf16.msra.mxu1 %v4883_v45 }
 0x476   :  { %3319 = vmatprep.subr.bf16.mxu0 %v4824_v5  ;;  %3335 = vmatprep.subr.bf16.mxu1 %v4827_v6 }
 0x53b   :  { %v1145_v39 = vpop.f32.mrb[8].mxu0  ;;  %v1216_v7 = vpop.f32.mrb[8].mxu1 }
 0x53c   :  { %v1221_v13 = vadd.f32 %v1145_v39, %v5056_v12  ;;  %v1223_v14 = vadd.f32 %v1216_v7, %v1074_v17  ;;  %v1147_v15 = vpop.f32.mrb[9].mxu0  ;;  %v1218_v16 = vpop.f32.mrb[9].mxu1  ;;  %v5058_v7 = vld [vmem:[#allocation22_spill] sm:$0xff] }
 0x53d   :  { %v1222_v19 = vadd.f32 %v1147_v15, %v1073_v9  ;;  %v1224_v20 = vadd.f32 %v1218_v16, %v1075_v11  ;;  %v1273_v8 = vadd.f32 %v5058_v7, %v4717_v30  ;;  %v5059_v9 = vld [vmem:[#allocation24_spill] sm:$0xff]  ;;  %v5060_v11 = vld [vmem:[#allocation23_spill] sm:$0xff] }
 0x53e   :  { %v2897_v23 = vmul.f32 -1.442695, %v1221_v13  ;;  %v1275_v10 = vadd.f32 %v5059_v9, %v4727_v27 }
 0x53f   :  { %v2898_v55 = vmul.f32 -1.442695, %v1222_v19  ;;  %v2899_v22 = vmul.f32 -1.442695, %v1224_v20 }
 0x540   :  { %4110 = vpow2.f32 %v2897_v23 }
 0x541   :  { %4112 = vpow2.f32 %v2898_v55 }
 0x542   :  { %4114 = vpow2.f32 %v2899_v22 }
 0x543   :  { %4116 = vtanh.f32 %v1223_v14 }
 0x54a   :  { %v4111_v18 = vpop.eup %4110 }
 0x54b   :  { %v4113_v56 = vpop.eup %4112  ;;  %v1228_v50 = vadd.f32 1.0, %v4111_v18 }
 0x54c   :  { %v1234_v49 = vadd.f32 1.0, %v4113_v56  ;;  %v4115_v21 = vpop.eup %4114 }
 0x54d   :  { %4118 = vrcp.f32 %v1228_v50  ;;  %v4117_v35 = vpop.eup %4116  ;;  %v1241_v61 = vadd.f32 1.0, %v4115_v21 }
 0x54e   :  { %4120 = vrcp.f32 %v1234_v49 }
 0x54f   :  { %4122 = vrcp.f32 %v1241_v61 }
 0x557   :  { %v4119_v57 = vpop.eup %4118 }
 0x558   :  { %v4121_v34 = vpop.eup %4120  ;;  %v1245_v60 = vmul.f32 %v4119_v57, %v4117_v35 }
 0x559   :  { %v1244_v44 = vmul.f32 %v4121_v34, %v4837_v62  ;;  %v4123_v63 = vpop.eup %4122  ;;  %v5057_v62 = vld [vmem:[#allocation21_spill] sm:$0xff] }
 0x55a   :  { %v1274_v51 = vadd.f32 %v5057_v62, %v4736_v32 }
 0x55b   :  { %v1246_v47 = vadd.f32 %v1245_v60, %v1244_v44 }
 0x55d   :  { %4124 = vtanh.f32 %v1246_v47 }
 0x567   :  { %v4125_v3 = vpop.eup %4124 }
 0x568   :  { %v1248_v28 = vmul.f32 %v4125_v3, %v4123_v63 }
 0x56a   :  { %2901 = vmatmul.mubr.msk.f32.vlgmr.msra.gmra.mrb[10].mxu0 %vm275_vm0, %v1248_v28  ;;  %2902 = vmatmul.mubr.msk.f32.vlgmr.msra.gmra.mrb[10].mxu1 %vm275_vm0, %v1248_v28 }
 0x56b   :  { %3321 = vmatpush1.bf16.msra.mxu0 %v4842_v4  ;;  %3337 = vmatpush1.bf16.msra.mxu1 %v4845_v40 }
 0x56c   :  { %3323 = vmatprep.subr.bf16.mxu0 %v4848_v46  ;;  %3339 = vmatprep.subr.bf16.mxu1 %v4851_v0 }
 0x56d   :  { %1543 = vmatprep.mubr.f32.mxu0 %v5050_v41  ;;  %1614 = vmatprep.mubr.f32.mxu1 %v5050_v41 }
 0x56f   :  { %3325 = vmatpush1.bf16.msra.mxu0 %v4856_v2  ;;  %3341 = vmatpush1.bf16.msra.mxu1 %v4859_v42 }
 0x570   :  { %3327 = vmatprep.subr.bf16.mxu0 %v4862_v53  ;;  %3343 = vmatprep.subr.bf16.mxu1 %v4865_v52 }
 0x573   :  { %3329 = vmatpush1.bf16.msra.mxu0 %v4868_v25  ;;  %3345 = vmatpush1.bf16.msra.mxu1 %v4871_v26 }
 0x574   :  { %3331 = vmatprep.subr.bf16.mxu0 %v4874_v29  ;;  %3347 = vmatprep.subr.bf16.mxu1 %v4877_v43 }
 0x577   :  { %3333 = vmatpush1.bf16.msra.mxu0 %v4880_v36  ;;  %3349 = vmatpush1.bf16.msra.mxu1 %v4883_v45 }
 0x578   :  { %3351 = vmatprep.subr.bf16.mxu0 %v4824_v5  ;;  %3367 = vmatprep.subr.bf16.mxu1 %v4827_v6 }
 0x63d   :  { %v1345_v17 = vpop.f32.mrb[10].mxu0  ;;  %v1416_v39 = vpop.f32.mrb[10].mxu1 }
 0x63e   :  { %v1421_v12 = vadd.f32 %v1345_v17, %v5060_v11  ;;  %v1423_v13 = vadd.f32 %v1416_v39, %v1274_v51  ;;  %v1347_v14 = vpop.f32.mrb[11].mxu0  ;;  %v1418_v15 = vpop.f32.mrb[11].mxu1  ;;  %v4311_v11 = vmov 0.0|0.0  }
 0x63f   :  { %v1422_v16 = vadd.f32 %v1347_v14, %v1273_v8  ;;  %v1424_v5 = vadd.f32 %v1418_v15, %v1275_v10  ;;  %v3018_v14 = vld [vmem:[%s5022_s4 + $0x10] sm:$0xff]   ;;  %v3019_v15 = vld [vmem:[%s5022_s4 + $0x18] sm:$0xff]  }
 0x640   :  { %v2903_v19 = vmul.f32 -1.442695, %v1421_v12  ;;  %v2922_v12 = vld [vmem:[%s5022_s4] sm:$0xff]  }
 0x641   :  { %v2904_v6 = vmul.f32 -1.442695, %v1422_v16  ;;  %v2905_v20 = vmul.f32 -1.442695, %v1424_v5  ;;  %v3020_v16 = vld [vmem:[%s5022_s4 + $0x20] sm:$0xff]   ;;  %v3021_v5 = vld [vmem:[%s5022_s4 + $0x28] sm:$0xff]  }
 0x642   :  { %4126 = vpow2.f32 %v2903_v19  ;;  %v3022_v19 = vld [vmem:[%s5022_s4 + $0x30] sm:$0xff]  }
 0x643   :  { %4128 = vpow2.f32 %v2904_v6  ;;  %v3023_v6 = vld [vmem:[%s5022_s4 + $0x38] sm:$0xff]  }
 0x644   :  { %4130 = vpow2.f32 %v2905_v20  ;;  %v1674_v20 = vadd.f32 %v4698_v24, %v4736_v32 }
 0x645   :  { %4132 = vtanh.f32 %v1423_v13  ;;  %v3017_v13 = vld [vmem:[%s5022_s4 + $0x8] sm:$0xff]  }
 0x64c   :  { %v4127_v23 = vpop.eup %4126 }
 0x64d   :  { %v4129_v55 = vpop.eup %4128  ;;  %v1428_v22 = vadd.f32 1.0, %v4127_v23 }
 0x64e   :  { %v1434_v18 = vadd.f32 1.0, %v4129_v55  ;;  %v4131_v56 = vpop.eup %4130 }
 0x64f   :  { %4134 = vrcp.f32 %v1428_v22  ;;  %v4133_v50 = vpop.eup %4132  ;;  %v1441_v57 = vadd.f32 1.0, %v4131_v56  ;;  %v1673_v22 = vadd.f32 %v4700_v54, %v4717_v30 }
 0x650   :  { %4136 = vrcp.f32 %v1434_v18  ;;  %v1675_v18 = vadd.f32 %v4702_v58, %v4727_v27 }
 0x651   :  { %4138 = vrcp.f32 %v1441_v57 }
 0x659   :  { %v4135_v49 = vpop.eup %4134 }
 0x65a   :  { %v4137_v21 = vpop.eup %4136  ;;  %v1445_v35 = vmul.f32 %v4135_v49, %v4133_v50 }
 0x65b   :  { %v1444_v34 = vmul.f32 %v4137_v21, %v1246_v47  ;;  %v4139_v61 = vpop.eup %4138 }
 0x65d   :  { %v1446_v60 = vadd.f32 %v1445_v35, %v1444_v34 }
 0x65f   :  { %4140 = vtanh.f32 %v1446_v60 }
 0x669   :  { %v4141_v44 = vpop.eup %4140 }
 0x66a   :  { %v1448_v63 = vmul.f32 %v4141_v44, %v4139_v61 }
 0x66c   :  { %2907 = vmatmul.mubr.msk.f32.vlgmr.msra.gmra.mrb[12].mxu0 %vm275_vm0, %v1448_v63  ;;  %2908 = vmatmul.mubr.msk.f32.vlgmr.msra.gmra.mrb[12].mxu1 %vm275_vm0, %v1448_v63 }
 0x66d   :  { %3353 = vmatpush1.bf16.msra.mxu0 %v4842_v4  ;;  %3369 = vmatpush1.bf16.msra.mxu1 %v4845_v40  ;;  %v1474_v4 = vadd.f32 %v4685_v1, %v4736_v32 }
 0x66e   :  { %3355 = vmatprep.subr.bf16.mxu0 %v4848_v46  ;;  %3371 = vmatprep.subr.bf16.mxu1 %v4851_v0  ;;  %v1473_v0 = vadd.f32 %v4687_v31, %v4717_v30 }
 0x66f   :  { %1743 = vmatprep.mubr.f32.mxu0 %v5050_v41  ;;  %1814 = vmatprep.mubr.f32.mxu1 %v5050_v41 }
 0x671   :  { %3357 = vmatpush1.bf16.msra.mxu0 %v4856_v2  ;;  %3373 = vmatpush1.bf16.msra.mxu1 %v4859_v42  ;;  %v1475_v2 = vadd.f32 %v4696_v48, %v4727_v27 }
 0x672   :  { %3359 = vmatprep.subr.bf16.mxu0 %v4862_v53  ;;  %3375 = vmatprep.subr.bf16.mxu1 %v4865_v52 }
 0x675   :  { %3361 = vmatpush1.bf16.msra.mxu0 %v4868_v25  ;;  %3377 = vmatpush1.bf16.msra.mxu1 %v4871_v26 }
 0x676   :  { %3363 = vmatprep.subr.bf16.mxu0 %v4874_v29  ;;  %3379 = vmatprep.subr.bf16.mxu1 %v4877_v43 }
 0x679   :  { %3365 = vmatpush1.bf16.msra.mxu0 %v4880_v36  ;;  %3381 = vmatpush1.bf16.msra.mxu1 %v4883_v45 }
 0x67a   :  { %3382 = vmatprep.subr.bf16.mxu0 %v4311_v11 }
 0x73f   :  { %v1545_v40 = vpop.f32.mrb[12].mxu0  ;;  %v1616_v46 = vpop.f32.mrb[12].mxu1 }
 0x740   :  { %v1621_v42 = vadd.f32 %v1545_v40, %v4694_v38  ;;  %v1623_v53 = vadd.f32 %v1616_v46, %v1474_v4  ;;  %v1547_v52 = vpop.f32.mrb[13].mxu0  ;;  %v1618_v25 = vpop.f32.mrb[13].mxu1 }
 0x741   :  { %v1622_v26 = vadd.f32 %v1547_v52, %v1473_v0  ;;  %v1624_v29 = vadd.f32 %v1618_v25, %v1475_v2  ;;  %v3904_v52 = vld [vmem:[#allocation5] ss:$16 sps:$4 sm:$0xff]   ;;  %v3905_v25 = vld [vmem:[#allocation5 + $0x24] ss:$16 sps:$4 sm:$0xff]  }
 0x742   :  { %v2909_v43 = vmul.f32 -1.442695, %v1621_v42 }
 0x743   :  { %v2910_v36 = vmul.f32 -1.442695, %v1622_v26  ;;  %v2911_v1 = vmul.f32 -1.442695, %v1624_v29  ;;  %v3907_v26 = vld [vmem:[#allocation5 + $0x20] ss:$16 sps:$4 sm:$0xff]  }
 0x744   :  { %4142 = vpow2.f32 %v2909_v43  ;;  %v3908_v29 = vld [vmem:[#allocation5 + $0x44] ss:$16 sps:$4 sm:$0xff]   ;;  %v3910_v43 = vld [vmem:[#allocation5 + $0x40] ss:$16 sps:$4 sm:$0xff]  }
 0x745   :  { %4144 = vpow2.f32 %v2910_v36  ;;  %v3911_v36 = vld [vmem:[#allocation5 + $0x64] ss:$16 sps:$4 sm:$0xff]  }
 0x746   :  { %4146 = vpow2.f32 %v2911_v1  ;;  %v3913_v1 = vld [vmem:[#allocation5 + $0x60] ss:$16 sps:$4 sm:$0xff]  }
 0x747   :  { %4148 = vtanh.f32 %v1623_v53  ;;  %v3902_v53 = vld [vmem:[#allocation5 + $0x4] ss:$16 sps:$4 sm:$0xff]  }
 0x74e   :  { %v4143_v45 = vpop.eup %4142 }
 0x74f   :  { %v4145_v47 = vpop.eup %4144  ;;  %v1628_v3 = vadd.f32 1.0, %v4143_v45  ;;  %v3914_v45 = vld [vmem:[#allocation5 + $0x84] ss:$16 sps:$4 sm:$0xff]  }
 0x750   :  { %v1634_v31 = vadd.f32 1.0, %v4145_v47  ;;  %v4147_v48 = vpop.eup %4146  ;;  %v3916_v47 = vld [vmem:[#allocation5 + $0x80] ss:$16 sps:$4 sm:$0xff]  }
 0x751   :  { %4150 = vrcp.f32 %v1628_v3  ;;  %v4149_v38 = vpop.eup %4148  ;;  %v1641_v17 = vadd.f32 1.0, %v4147_v48  ;;  %v3917_v3 = vld [vmem:[#allocation5 + $0xa4] ss:$16 sps:$4 sm:$0xff]  }
 0x752   :  { %4152 = vrcp.f32 %v1634_v31  ;;  %v3919_v31 = vld [vmem:[#allocation5 + $0xa0] ss:$16 sps:$4 sm:$0xff]   ;;  %v3920_v48 = vld [vmem:[#allocation5 + $0xc4] ss:$16 sps:$4 sm:$0xff]  }
 0x753   :  { %4154 = vrcp.f32 %v1641_v17  ;;  %v3950_v17 = vld [vmem:[#allocation7 + $0x4] ss:$8 sps:$4 sm:$0xff]  }
 0x754   :  { %3471 = vmatprep.subr.bf16.mxu1 %v3950_v17  ;;  %v3985_v17 = vld [vmem:[#allocation7 + $0xb0] ss:$8 sps:$4 sm:$0xff]  }
 0x75b   :  { %v4151_v28 = vpop.eup %4150 }
 0x75c   :  { %v4153_v62 = vpop.eup %4152  ;;  %v1645_v51 = vmul.f32 %v4151_v28, %v4149_v38  ;;  %v3922_v38 = vld [vmem:[#allocation5 + $0xc0] ss:$16 sps:$4 sm:$0xff]   ;;  %v3923_v28 = vld [vmem:[#allocation5 + $0xe4] ss:$16 sps:$4 sm:$0xff]  }
 0x75d   :  { %v1644_v39 = vmul.f32 %v4153_v62, %v1446_v60  ;;  %v4155_v8 = vpop.eup %4154  ;;  %v3925_v62 = vld [vmem:[#allocation5 + $0xe0] ss:$16 sps:$4 sm:$0xff]  }
 0x75f   :  { %v4948_v7 = vadd.f32 %v1645_v51, %v1644_v39  ;;  %v3926_v51 = vld [vmem:[#allocation5 + $0xc] ss:$16 sps:$4 sm:$0xff]   ;;  %v3952_v39 = vld [vmem:[#allocation7] ss:$8 sps:$4 sm:$0xff]  }
 0x761   :  { %4156 = vtanh.f32 %v4948_v7 }
 0x76b   :  { %v4157_v9 = vpop.eup %4156 }
 0x76c   :  { %v1648_v10 = vmul.f32 %v4157_v9, %v4155_v8  ;;  %v3955_v8 = vld [vmem:[#allocation7 + $0x10] ss:$8 sps:$4 sm:$0xff]   ;;  %v3956_v9 = vld [vmem:[#allocation7 + $0x24] ss:$8 sps:$4 sm:$0xff]  }
 0x76e   :  { %2913 = vmatmul.mubr.msk.f32.vlgmr.msra.gmra.mrb[14].mxu0 %vm275_vm0, %v1648_v10  ;;  %2914 = vmatmul.mubr.msk.f32.vlgmr.msra.gmra.mrb[14].mxu1 %vm275_vm0, %v1648_v10  ;;  %v3958_v10 = vld [vmem:[#allocation7 + $0x20] ss:$8 sps:$4 sm:$0xff]  }
 0x76f   :  { %3384 = vmatpush3.bf16.msra.mxu0 %v2922_v12  ;;  %3123 = vmatprep.mubr.msk.f32.mxu0 %vm4312_vm1, %v5050_v41 }
 0x770   :  { %3385 = vmatprep.subr.bf16.mxu0 %v4311_v11  ;;  %3473 = vmatpush1.bf16.msra.mxu1 %v3952_v39  ;;  %v3986_v39 = vld [vmem:[#allocation7 + $0xc4] ss:$8 sps:$4 sm:$0xff]  }
 0x773   :  { %3387 = vmatpush3.bf16.msra.mxu0 %v3017_v13 }
 0x774   :  { %3388 = vmatprep.subr.bf16.mxu0 %v4311_v11 }
 0x777   :  { %3390 = vmatpush3.bf16.msra.mxu0 %v3018_v14 }
 0x778   :  { %3391 = vmatprep.subr.bf16.mxu0 %v4311_v11 }
 0x77b   :  { %3393 = vmatpush3.bf16.msra.mxu0 %v3019_v15 }
 0x77c   :  { %3394 = vmatprep.subr.bf16.mxu0 %v4311_v11 }
 0x77f   :  { %3396 = vmatpush3.bf16.msra.mxu0 %v3020_v16 }
 0x780   :  { %3397 = vmatprep.subr.bf16.mxu0 %v4311_v11 }
 0x783   :  { %3399 = vmatpush3.bf16.msra.mxu0 %v3021_v5 }
 0x784   :  { %3400 = vmatprep.subr.bf16.mxu0 %v4311_v11 }
 0x787   :  { %3402 = vmatpush3.bf16.msra.mxu0 %v3022_v19 }
 0x788   :  { %3403 = vmatprep.subr.bf16.mxu0 %v4311_v11  ;;  %v2918_v11 = vld [vmem:[%s5023_s5] ss:$0 sm:$0xff] }
 0x78b   :  { %3405 = vmatpush3.bf16.msra.mxu0 %v3023_v6 }
 0x78c   :  { %3407 = vmatprep.subr.bf16.mxu0 %v3902_v53  ;;  %v3959_v53 = vld [vmem:[#allocation7 + $0x34] ss:$8 sps:$4 sm:$0xff]  }
 0x841   :  { %v1745_v23 = vpop.f32.mrb[14].mxu0  ;;  %v1816_v55 = vpop.f32.mrb[14].mxu1 }
 0x842   :  { %v1821_v56 = vadd.f32 %v1745_v23, %v4705_v59  ;;  %v1823_v50 = vadd.f32 %v1816_v55, %v1674_v20  ;;  %v1747_v49 = vpop.f32.mrb[15].mxu0  ;;  %v1818_v21 = vpop.f32.mrb[15].mxu1 }
 0x843   :  { %v1822_v35 = vadd.f32 %v1747_v49, %v1673_v22  ;;  %v1824_v57 = vadd.f32 %v1818_v21, %v1675_v18 }
 0x844   :  { %v2915_v34 = vmul.f32 -1.442695, %v1821_v56 }
 0x845   :  { %v2916_v60 = vmul.f32 -1.442695, %v1822_v35  ;;  %v2917_v24 = vmul.f32 -1.442695, %v1824_v57 }
 0x846   :  { %4158 = vpow2.f32 %v2915_v34 }
 0x847   :  { %4160 = vpow2.f32 %v2916_v60 }
 0x848   :  { %4162 = vpow2.f32 %v2917_v24 }
 0x849   :  { %4164 = vtanh.f32 %v1823_v50 }
 0x850   :  { %v4159_v32 = vpop.eup %4158 }
 0x851   :  { %v4161_v61 = vpop.eup %4160  ;;  %v1828_v44 = vadd.f32 1.0, %v4159_v32  ;;  %v3928_v32 = vld [vmem:[#allocation5 + $0x8] ss:$16 sps:$4 sm:$0xff]  }
 0x852   :  { %v1834_v54 = vadd.f32 1.0, %v4161_v61  ;;  %v4163_v58 = vpop.eup %4162 }
 0x853   :  { %4166 = vrcp.f32 %v1828_v44  ;;  %v4165_v59 = vpop.eup %4164  ;;  %v1841_v4 = vadd.f32 1.0, %v4163_v58  ;;  %v3929_v44 = vld [vmem:[#allocation5 + $0x2c] ss:$16 sps:$4 sm:$0xff]  }
 0x854   :  { %4168 = vrcp.f32 %v1834_v54  ;;  %v3931_v54 = vld [vmem:[#allocation5 + $0x28] ss:$16 sps:$4 sm:$0xff]   ;;  %v3932_v58 = vld [vmem:[#allocation5 + $0x4c] ss:$16 sps:$4 sm:$0xff]  }
 0x855   :  { %4170 = vrcp.f32 %v1841_v4  ;;  %v3940_v4 = vld [vmem:[#allocation5 + $0x88] ss:$16 sps:$4 sm:$0xff]  }
 0x85d   :  { %v4167_v30 = vpop.eup %4166 }
 0x85e   :  { %v4169_v27 = vpop.eup %4168  ;;  %v1845_v63 = vmul.f32 %v4167_v30, %v4165_v59  ;;  %v3934_v59 = vld [vmem:[#allocation5 + $0x48] ss:$16 sps:$4 sm:$0xff]   ;;  %v3935_v30 = vld [vmem:[#allocation5 + $0x6c] ss:$16 sps:$4 sm:$0xff]  }
 0x85f   :  { %v1844_v40 = vmul.f32 %v4169_v27, %v4948_v7  ;;  %v4171_v0 = vpop.eup %4170  ;;  %v3953_v7 = vld [vmem:[#allocation7 + $0x14] ss:$8 sps:$4 sm:$0xff]   ;;  %v3937_v27 = vld [vmem:[#allocation5 + $0x68] ss:$16 sps:$4 sm:$0xff]  }
 0x860   :  { %3475 = vmatprep.subr.bf16.mxu1 %v3953_v7  ;;  %v3988_v7 = vld [vmem:[#allocation7 + $0xc0] ss:$8 sps:$4 sm:$0xff]  }
 0x861   :  { %v1846_v46 = vadd.f32 %v1845_v63, %v1844_v40  ;;  %3477 = vmatpush1.bf16.msra.mxu1 %v3955_v8  ;;  %v3938_v63 = vld [vmem:[#allocation5 + $0x8c] ss:$16 sps:$4 sm:$0xff]  }
 0x862   :  { %3479 = vmatprep.subr.bf16.mxu1 %v3956_v9  ;;  %v3941_v40 = vld [vmem:[#allocation5 + $0xac] ss:$16 sps:$4 sm:$0xff]   ;;  %v3991_v9 = vld [vmem:[#allocation7 + $0xd0] ss:$8 sps:$4 sm:$0xff]  }
 0x863   :  { %4172 = vtanh.f32 %v1846_v46  ;;  %v3943_v46 = vld [vmem:[#allocation5 + $0xa8] ss:$16 sps:$4 sm:$0xff]   ;;  %v3989_v8 = vld [vmem:[#allocation7 + $0xd4] ss:$8 sps:$4 sm:$0xff]  }
 0x865   :  { %3481 = vmatpush1.bf16.msra.mxu1 %v3958_v10  ;;  %v3992_v10 = vld [vmem:[#allocation7 + $0xe4] ss:$8 sps:$4 sm:$0xff]  }
 0x866   :  { %3483 = vmatprep.subr.bf16.mxu1 %v3959_v53 }
 0x86d   :  { %v4173_v2 = vpop.eup %4172 }
 0x86e   :  { %v1848_v42 = vmul.f32 %v4173_v2, %v4171_v0  ;;  %v3944_v0 = vld [vmem:[#allocation5 + $0xcc] ss:$16 sps:$4 sm:$0xff]  }
 0x86f   :  { %v3947_v2 = vld [vmem:[#allocation5 + $0xec] ss:$16 sps:$4 sm:$0xff]  }
 0x870   :  { %3124 = vmatmul.mubr.f32.vlgmr.msra.gmra.mrb[16].mxu0 %v1848_v42  ;;  %v3949_v42 = vld [vmem:[#allocation5 + $0xe8] ss:$16 sps:$4 sm:$0xff]  }
 0x871   :  { %2161 = vmatprep.mubr.f32.mxu0 %v5050_v41  ;;  %3409 = vmatpush1.bf16.msra.mxu0 %v3904_v52  ;;  %v3961_v52 = vld [vmem:[#allocation7 + $0x30] ss:$8 sps:$4 sm:$0xff]  }
 0x872   :  { %3411 = vmatprep.subr.bf16.mxu0 %v3905_v25  ;;  %3485 = vmatpush1.bf16.msra.mxu1 %v3961_v52  ;;  %v3962_v25 = vld [vmem:[#allocation7 + $0x44] ss:$8 sps:$4 sm:$0xff]  }
 0x873   :  { %3487 = vmatprep.subr.bf16.mxu1 %v3962_v25  ;;  %v5062_v25 = vld [vmem:[#allocation14_spill] sm:$0xff] }
 0x875   :  { %3413 = vmatpush1.bf16.msra.mxu0 %v3907_v26  ;;  %v3964_v26 = vld [vmem:[#allocation7 + $0x40] ss:$8 sps:$4 sm:$0xff]  }
 0x876   :  { %3415 = vmatprep.subr.bf16.mxu0 %v3908_v29  ;;  %3489 = vmatpush1.bf16.msra.mxu1 %v3964_v26  ;;  %v3965_v29 = vld [vmem:[#allocation7 + $0x54] ss:$8 sps:$4 sm:$0xff]  }
 0x877   :  { %3491 = vmatprep.subr.bf16.mxu1 %v3965_v29 }
 0x879   :  { %3417 = vmatpush1.bf16.msra.mxu0 %v3910_v43  ;;  %v3967_v43 = vld [vmem:[#allocation7 + $0x50] ss:$8 sps:$4 sm:$0xff]  }
 0x87a   :  { %3419 = vmatprep.subr.bf16.mxu0 %v3911_v36  ;;  %3493 = vmatpush1.bf16.msra.mxu1 %v3967_v43  ;;  %v3968_v36 = vld [vmem:[#allocation7 + $0x64] ss:$8 sps:$4 sm:$0xff]  }
 0x87b   :  { %3495 = vmatprep.subr.bf16.mxu1 %v3968_v36 }
 0x87d   :  { %3421 = vmatpush1.bf16.msra.mxu0 %v3913_v1  ;;  %v3970_v1 = vld [vmem:[#allocation7 + $0x60] ss:$8 sps:$4 sm:$0xff]  }
 0x87e   :  { %3423 = vmatprep.subr.bf16.mxu0 %v3914_v45  ;;  %3497 = vmatpush1.bf16.msra.mxu1 %v3970_v1  ;;  %v3971_v45 = vld [vmem:[#allocation7 + $0x74] ss:$8 sps:$4 sm:$0xff]  }
 0x87f   :  { %3499 = vmatprep.subr.bf16.mxu1 %v3971_v45 }
 0x881   :  { %3425 = vmatpush1.bf16.msra.mxu0 %v3916_v47  ;;  %v3973_v47 = vld [vmem:[#allocation7 + $0x70] ss:$8 sps:$4 sm:$0xff]  }
 0x882   :  { %3427 = vmatprep.subr.bf16.mxu0 %v3917_v3  ;;  %3501 = vmatpush1.bf16.msra.mxu1 %v3973_v47  ;;  %v3974_v3 = vld [vmem:[#allocation7 + $0x84] ss:$8 sps:$4 sm:$0xff]  }
 0x883   :  { %3503 = vmatprep.subr.bf16.mxu1 %v3974_v3 }
 0x885   :  { %3429 = vmatpush1.bf16.msra.mxu0 %v3919_v31  ;;  %v3976_v31 = vld [vmem:[#allocation7 + $0x80] ss:$8 sps:$4 sm:$0xff]  }
 0x886   :  { %3431 = vmatprep.subr.bf16.mxu0 %v3920_v48  ;;  %3505 = vmatpush1.bf16.msra.mxu1 %v3976_v31  ;;  %v3977_v48 = vld [vmem:[#allocation7 + $0x94] ss:$8 sps:$4 sm:$0xff]  }
 0x887   :  { %3507 = vmatprep.subr.bf16.mxu1 %v3977_v48 }
 0x889   :  { %3433 = vmatpush1.bf16.msra.mxu0 %v3922_v38  ;;  %v3979_v38 = vld [vmem:[#allocation7 + $0x90] ss:$8 sps:$4 sm:$0xff]  }
 0x88a   :  { %3435 = vmatprep.subr.bf16.mxu0 %v3923_v28  ;;  %3509 = vmatpush1.bf16.msra.mxu1 %v3979_v38  ;;  %v3980_v28 = vld [vmem:[#allocation7 + $0xa4] ss:$8 sps:$4 sm:$0xff]  }
 0x88b   :  { %3511 = vmatprep.subr.bf16.mxu1 %v3980_v28 }
 0x88d   :  { %3437 = vmatpush1.bf16.msra.mxu0 %v3925_v62  ;;  %v3982_v62 = vld [vmem:[#allocation7 + $0xa0] ss:$8 sps:$4 sm:$0xff]  }
 0x88e   :  { %3439 = vmatprep.subr.bf16.mxu0 %v3926_v51  ;;  %3513 = vmatpush1.bf16.msra.mxu1 %v3982_v62  ;;  %v3983_v51 = vld [vmem:[#allocation7 + $0xb4] ss:$8 sps:$4 sm:$0xff]  }
 0x88f   :  { %3515 = vmatprep.subr.bf16.mxu1 %v3983_v51 }
 0x892   :  { %3517 = vmatpush1.bf16.msra.mxu1 %v3985_v17 }
 0x893   :  { %3519 = vmatprep.subr.bf16.mxu1 %v3986_v39 }
 0x896   :  { %3521 = vmatpush1.bf16.msra.mxu1 %v3988_v7 }
 0x897   :  { %3523 = vmatprep.subr.bf16.mxu1 %v3989_v8 }
 0x89a   :  { %3525 = vmatpush1.bf16.msra.mxu1 %v3991_v9 }
 0x89b   :  { %3527 = vmatprep.subr.bf16.mxu1 %v3992_v10 }
 0x943   :  { %v1954_v12 = vpop.f32.mrb[16].mxu0 }
 0x944   :  { %v1955_v13 = vadd.f32 %v2918_v11, %v1954_v12  ;;  %v3125_v14 = vpop.f32.mrb[17].mxu0  ;;  %v3994_v11 = vld [vmem:[#allocation7 + $0xe0] ss:$8 sps:$4 sm:$0xff]   ;;  %v3995_v12 = vld [vmem:[#allocation7 + $0xf4] ss:$8 sps:$4 sm:$0xff]  }
 0x945   :  { %3529 = vmatpush1.bf16.msra.mxu1 %v3994_v11  ;;  %v3998_v14 = vld [vmem:[#allocation7 + $0x104] ss:$8 sps:$4 sm:$0xff]  }
 0x946   :  { %v1958_v15 = vmax.f32 %v1955_v13, 0.0  ;;  %v3997_v13 = vld [vmem:[#allocation7 + $0xf0] ss:$8 sps:$4 sm:$0xff]   ;;  %3531 = vmatprep.subr.bf16.mxu1 %v3995_v12 }
 0x948   :  { %v1959_v16 = vrot.slane %v1958_v15, 4 }
 0x949   :  { %3533 = vmatpush1.bf16.msra.mxu1 %v3997_v13 }
 0x94a   :  { %v1960_v5 = vadd.f32 %v1959_v16, %v1958_v15  ;;  %3535 = vmatprep.subr.bf16.mxu1 %v3998_v14  ;;  %v5061_v16 = vld [vmem:[#allocation13_spill] sm:$0xff] }
 0x94c   :  { %v1961_v19 = vrot.slane %v1960_v5, 2 }
 0x94e   :  { %v1962_v6 = vadd.f32 %v1961_v19, %v1960_v5 }
 0x950   :  { %v1963_v20 = vrot.slane %v1962_v6, 1 }
 0x952   :  { %v1964_v23 = vadd.f32 %v1963_v20, %v1962_v6 }
 0x954   :  { %v1966_v55 = vmul.f32 0.125, %v1964_v23 }
 0x956   :  { %v1967_v22 = vsub.f32 %v1958_v15, %v1966_v55  ;;  %v2075_v15 = vld [vmem:[%s5025_s7] sm:$0xf] }
 0x957   :  { %v2080_v5 = vrot.slane %v2075_v15, %v5061_v16  ;;  %v2084_v19 = vrot.slane %v2075_v15, %v4547_v33  ;;  %v2088_v53 = vrot.slane %v2075_v15, %v4553_v37  ;;  %v2092_v26 = vrot.slane %v2075_v15, %v5062_v25 }
 0x958   :  { %v1968_v18 = vmul.f32 %v1967_v22, %v1967_v22 }
 0x95a   :  { %v1969_v56 = vrot.slane %v1968_v18, 4 }
 0x95c   :  { %v1970_v50 = vadd.f32 %v1969_v56, %v1968_v18 }
 0x95e   :  { %v1971_v49 = vrot.slane %v1970_v50, 2 }
 0x960   :  { %v1972_v21 = vadd.f32 %v1971_v49, %v1970_v50 }
 0x962   :  { %v1973_v35 = vrot.slane %v1972_v21, 1 }
 0x964   :  { %v1974_v57 = vadd.f32 %v1973_v35, %v1972_v21 }
 0x966   :  { %v1975_v34 = vmul.f32 0.125, %v1974_v57 }
 0x968   :  { %v1976_v60 = vadd.f32 1e-05, %v1975_v34 }
 0x96a   :  { %4174 = vrsqrt.f32 %v1976_v60 }
 0x974   :  { %v4175_v24 = vpop.eup %4174 }
 0x975   :  { %v1978_v61 = vmul.f32 %v4175_v24, %v1967_v22 }
 0x977   :  { %2162 = vmatmul.mubr.f32.vlgmr.msra.gmra.mrb[18].mxu0 %v1978_v61 }
 0x978   :  { %3441 = vmatpush1.bf16.msra.mxu0 %v3928_v32  ;;  %2232 = vmatprep.mubr.f32.mxu0 %v5050_v41  ;;  %v3946_v41 = vld [vmem:[#allocation5 + $0xc8] ss:$16 sps:$4 sm:$0xff]  }
 0x979   :  { %3443 = vmatprep.subr.bf16.mxu0 %v3929_v44 }
 0x97c   :  { %3445 = vmatpush1.bf16.msra.mxu0 %v3931_v54 }
 0x97d   :  { %3447 = vmatprep.subr.bf16.mxu0 %v3932_v58 }
 0x980   :  { %3449 = vmatpush1.bf16.msra.mxu0 %v3934_v59 }
 0x981   :  { %3451 = vmatprep.subr.bf16.mxu0 %v3935_v30 }
 0x984   :  { %3453 = vmatpush1.bf16.msra.mxu0 %v3937_v27 }
 0x985   :  { %3455 = vmatprep.subr.bf16.mxu0 %v3938_v63 }
 0x988   :  { %3457 = vmatpush1.bf16.msra.mxu0 %v3940_v4 }
 0x989   :  { %3459 = vmatprep.subr.bf16.mxu0 %v3941_v40 }
 0x98c   :  { %3461 = vmatpush1.bf16.msra.mxu0 %v3943_v46 }
 0x98d   :  { %3463 = vmatprep.subr.bf16.mxu0 %v3944_v0 }
 0x990   :  { %3465 = vmatpush1.bf16.msra.mxu0 %v3946_v41 }
 0x991   :  { %3467 = vmatprep.subr.bf16.mxu0 %v3947_v2 }
 0x994   :  { %3469 = vmatpush1.bf16.msra.mxu0 %v3949_v42 }
 0x997   :  { %2233 = vmatmul.mubr.f32.vlgmr.msra.gmra.mrb[20].mxu0 %v1978_v61 }
 0xa4a   :  { %v2163_v6 = vpop.f32.mrb[18].mxu0 }
 0xa4b   :  { %v2164_v20 = vadd.f32 %v2163_v6, %v2080_v5  ;;  %v2165_v23 = vpop.f32.mrb[19].mxu0 }
 0xa4c   :  { %v2166_v55 = vadd.f32 %v2165_v23, %v2084_v19  ;;  %v4000_v23 = vld [vmem:[#allocation7 + $0x100] ss:$8 sps:$4 sm:$0xff]  }
 0xa4d   :  { %v2239_v22 = vmax.f32 %v2164_v20, 0.0 }
 0xa4e   :  { %v2240_v18 = vmax.f32 %v2166_v55, 0.0 }
 0xa4f   :  { %v2243_v56 = vrot.slane %v2239_v22, 4 }
 0xa50   :  { %v2249_v50 = vrot.slane %v2240_v18, 4 }
 0xa51   :  { %v2244_v49 = vadd.f32 %v2243_v56, %v2239_v22 }
 0xa52   :  { %v2250_v21 = vadd.f32 %v2249_v50, %v2240_v18 }
 0xa53   :  { %v2245_v35 = vrot.slane %v2244_v49, 2 }
 0xa54   :  { %v2251_v57 = vrot.slane %v2250_v21, 2 }
 0xa55   :  { %v2246_v34 = vadd.f32 %v2245_v35, %v2244_v49  ;;  %v4003_v49 = vld [vmem:[#allocation7 + $0x110] ss:$8 sps:$4 sm:$0xff]   ;;  %v4004_v35 = vld [vmem:[#allocation7 + $0x124] ss:$8 sps:$4 sm:$0xff]  }
 0xa56   :  { %v2252_v60 = vadd.f32 %v2251_v57, %v2250_v21 }
 0xa57   :  { %v2247_v24 = vrot.slane %v2246_v34, 1 }
 0xa58   :  { %v2253_v32 = vrot.slane %v2252_v60, 1 }
 0xa59   :  { %v2248_v61 = vadd.f32 %v2247_v24, %v2246_v34 }
 0xa5a   :  { %v2254_v44 = vadd.f32 %v2253_v32, %v2252_v60  ;;  %v4006_v60 = vld [vmem:[#allocation7 + $0x120] ss:$8 sps:$4 sm:$0xff]   ;;  %v4007_v32 = vld [vmem:[#allocation7 + $0x134] ss:$8 sps:$4 sm:$0xff]  }
 0xa5b   :  { %v2267_v54 = vmul.f32 0.125, %v2248_v61 }
 0xa5c   :  { %v2268_v58 = vmul.f32 0.125, %v2254_v44 }
 0xa5d   :  { %v2271_v59 = vsub.f32 %v2239_v22, %v2267_v54  ;;  %v4009_v54 = vld [vmem:[#allocation7 + $0x130] ss:$8 sps:$4 sm:$0xff]  }
 0xa5e   :  { %v2272_v30 = vsub.f32 %v2240_v18, %v2268_v58  ;;  %v4001_v18 = vld [vmem:[#allocation7 + $0x114] ss:$8 sps:$4 sm:$0xff]  }
 0xa5f   :  { %v2275_v27 = vmul.f32 %v2271_v59, %v2271_v59 }
 0xa60   :  { %v2276_v63 = vmul.f32 %v2272_v30, %v2272_v30 }
 0xa61   :  { %v2279_v4 = vrot.slane %v2275_v27, 4 }
 0xa62   :  { %v2285_v40 = vrot.slane %v2276_v63, 4 }
 0xa63   :  { %v2280_v46 = vadd.f32 %v2279_v4, %v2275_v27 }
 0xa64   :  { %v2286_v0 = vadd.f32 %v2285_v40, %v2276_v63  ;;  %v4012_v63 = vld [vmem:[#allocation7 + $0x140] ss:$8 sps:$4 sm:$0xff]   ;;  %v4013_v40 = vld [vmem:[#allocation7 + $0x154] ss:$8 sps:$4 sm:$0xff]  }
 0xa65   :  { %v2281_v41 = vrot.slane %v2280_v46, 2 }
 0xa66   :  { %v2287_v2 = vrot.slane %v2286_v0, 2 }
 0xa67   :  { %v2282_v42 = vadd.f32 %v2281_v41, %v2280_v46  ;;  %v4015_v41 = vld [vmem:[#allocation7 + $0x150] ss:$8 sps:$4 sm:$0xff]  }
 0xa68   :  { %v2288_v52 = vadd.f32 %v2287_v2, %v2286_v0  ;;  %v4016_v2 = vld [vmem:[#allocation7 + $0x164] ss:$8 sps:$4 sm:$0xff]  }
 0xa69   :  { %v2283_v29 = vrot.slane %v2282_v42, 1 }
 0xa6a   :  { %v2289_v43 = vrot.slane %v2288_v52, 1  ;;  %v2234_v36 = vpop.f32.mrb[20].mxu0 }
 0xa6b   :  { %v2284_v1 = vadd.f32 %v2283_v29, %v2282_v42  ;;  %v2235_v45 = vadd.f32 %v2234_v36, %v2088_v53  ;;  %v2236_v47 = vpop.f32.mrb[21].mxu0  ;;  %v4018_v53 = vld [vmem:[#allocation7 + $0x160] ss:$8 sps:$4 sm:$0xff]   ;;  %v4022_v29 = vld [vmem:[#allocation7 + $0x184] ss:$8 sps:$4 sm:$0xff]  }
 0xa6c   :  { %v2290_v3 = vadd.f32 %v2289_v43, %v2288_v52  ;;  %v2237_v31 = vadd.f32 %v2236_v47, %v2092_v26  ;;  %v4019_v52 = vld [vmem:[#allocation7 + $0x174] ss:$8 sps:$4 sm:$0xff]   ;;  %v4021_v26 = vld [vmem:[#allocation7 + $0x170] ss:$8 sps:$4 sm:$0xff]  }
 0xa6d   :  { %v2303_v48 = vmul.f32 0.125, %v2284_v1  ;;  %v2241_v38 = vmax.f32 %v2235_v45, 0.0  ;;  %v4024_v45 = vld [vmem:[#allocation7 + $0x180] ss:$8 sps:$4 sm:$0xff]   ;;  %v4025_v47 = vld [vmem:[#allocation7 + $0x194] ss:$8 sps:$4 sm:$0xff]  }
 0xa6e   :  { %v2304_v28 = vmul.f32 0.125, %v2290_v3  ;;  %v2242_v62 = vmax.f32 %v2237_v31, 0.0  ;;  %v4027_v31 = vld [vmem:[#allocation7 + $0x190] ss:$8 sps:$4 sm:$0xff]  }
 0xa6f   :  { %v2307_v51 = vadd.f32 1e-05, %v2303_v48  ;;  %v2255_v17 = vrot.slane %v2241_v38, 4  ;;  %v4028_v48 = vld [vmem:[#allocation7 + $0x1a4] ss:$8 sps:$4 sm:$0xff]  }
 0xa70   :  { %v2308_v39 = vadd.f32 1e-05, %v2304_v28  ;;  %v2261_v7 = vrot.slane %v2242_v62, 4  ;;  %v4030_v28 = vld [vmem:[#allocation7 + $0x1a0] ss:$8 sps:$4 sm:$0xff]  }
 0xa71   :  { %4176 = vrsqrt.f32 %v2307_v51  ;;  %v2256_v37 = vadd.f32 %v2255_v17, %v2241_v38  ;;  %v4033_v17 = vld [vmem:[#allocation7 + $0x1b0] ss:$8 sps:$4 sm:$0xff]  }
 0xa72   :  { %v2262_v8 = vadd.f32 %v2261_v7, %v2242_v62  ;;  %4178 = vrsqrt.f32 %v2308_v39  ;;  %v4034_v39 = vld [vmem:[#allocation7 + $0x1c4] ss:$8 sps:$4 sm:$0xff]  }
 0xa73   :  { %v2257_v10 = vrot.slane %v2256_v37, 2 }
 0xa74   :  { %v2263_v9 = vrot.slane %v2262_v8, 2 }
 0xa75   :  { %v2258_v13 = vadd.f32 %v2257_v10, %v2256_v37  ;;  %v4036_v37 = vld [vmem:[#allocation7 + $0x1c0] ss:$8 sps:$4 sm:$0xff]   ;;  %v4040_v10 = vld [vmem:[#allocation7 + $0x1e4] ss:$8 sps:$4 sm:$0xff]  }
 0xa76   :  { %v2264_v11 = vadd.f32 %v2263_v9, %v2262_v8  ;;  %v4037_v8 = vld [vmem:[#allocation7 + $0x1d4] ss:$8 sps:$4 sm:$0xff]   ;;  %v4039_v9 = vld [vmem:[#allocation7 + $0x1d0] ss:$8 sps:$4 sm:$0xff]  }
 0xa77   :  { %v2259_v6 = vrot.slane %v2258_v13, 1 }
 0xa78   :  { %v2265_v12 = vrot.slane %v2264_v11, 1 }
 0xa79   :  { %v2260_v50 = vadd.f32 %v2259_v6, %v2258_v13  ;;  %v4045_v13 = vld [vmem:[#allocation7 + $0x1f0] ss:$8 sps:$4 sm:$0xff]   ;;  %v3032_v6 = vld [vmem:[#allocation8 + $0x48] sm:$0xff]  }
 0xa7a   :  { %v2266_v14 = vadd.f32 %v2265_v12, %v2264_v11  ;;  %v4042_v11 = vld [vmem:[#allocation7 + $0x1e0] ss:$8 sps:$4 sm:$0xff]   ;;  %v4043_v12 = vld [vmem:[#allocation7 + $0x1f4] ss:$8 sps:$4 sm:$0xff]  }
 0xa7b   :  { %v4177_v15 = vpop.eup %4176  ;;  %v2269_v34 = vmul.f32 0.125, %v2260_v50  ;;  %v3027_v50 = vld [vmem:[#allocation8 + $0x20] sm:$0xff]  }
 0xa7c   :  { %v4179_v5 = vpop.eup %4178  ;;  %v2270_v19 = vmul.f32 0.125, %v2266_v14  ;;  %v2315_v22 = vmul.f32 %v4177_v15, %v2271_v59  ;;  %v4010_v59 = vld [vmem:[#allocation7 + $0x144] ss:$8 sps:$4 sm:$0xff]  }
 0xa7d   :  { %v2316_v20 = vmul.f32 %v4179_v5, %v2272_v30  ;;  %v4998_v44 = vsub.f32 %v2241_v38, %v2269_v34  ;;  %v3031_v5 = vld [vmem:[#allocation8 + $0x40] sm:$0xff]   ;;  %v3038_v34 = vld [vmem:[#allocation8 + $0x78] sm:$0xff]  }
 0xa7e   :  { %v2274_v55 = vsub.f32 %v2242_v62, %v2270_v19  ;;  %v4031_v62 = vld [vmem:[#allocation7 + $0x1b4] ss:$8 sps:$4 sm:$0xff]   ;;  %3599 = vmatprep.subr.bf16.mxu0 %v3031_v5  ;;  %v2954_v19 = vld [vmem:[#allocation8] sm:$0xff]  }
 0xa7f   :  { %2587 = vmatprep.mubr.f32.mxu1 %v2316_v20  ;;  %v2277_v27 = vmul.f32 %v4998_v44, %v4998_v44  ;;  %3601 = vmatpush3.bf16.msra.mxu0 %v2954_v19  ;;  %v3024_v20 = vld [vmem:[#allocation8 + $0x8] sm:$0xff]   ;;  %v2847_v5 = vld [vmem:[%s5030_s12] sm:$0x1] }
 0xa80   :  { %v2278_v56 = vmul.f32 %v2274_v55, %v2274_v55  ;;  %2588 = vmatmul.mubr.f32.vlgmr.msra.gmra.mrb[16].mxu1 %v2315_v22  ;;  %3603 = vmatprep.subr.bf16.mxu0 %v3032_v6  ;;  %v3034_v22 = vld [vmem:[#allocation8 + $0x58] sm:$0xff]   ;;  %v2848_v6 = vunpack.c.l.bf16 %v2847_v5 }
 0xa81   :  { %3537 = vmatpush1.bf16.msra.mxu1 %v4000_v23  ;;  %v2291_v0 = vrot.slane %v2277_v27, 4  ;;  %v3033_v23 = vld [vmem:[#allocation8 + $0x50] sm:$0xff]  }
 0xa82   :  { %v2297_v21 = vrot.slane %v2278_v56, 4  ;;  %3539 = vmatprep.subr.bf16.mxu1 %v4001_v18  ;;  %v3026_v18 = vld [vmem:[#allocation8 + $0x18] sm:$0xff]  }
 0xa83   :  { %v2292_v42 = vadd.f32 %v2291_v0, %v2277_v27  ;;  %3605 = vmatpush3.bf16.msra.mxu0 %v3024_v20  ;;  %v2919_v20 = vld [vmem:[%s5029_s11] ss:$0 sm:$0xff] }
 0xa84   :  { %v2298_v57 = vadd.f32 %v2297_v21, %v2278_v56  ;;  %3607 = vmatprep.subr.bf16.mxu0 %v3033_v23  ;;  %v3035_v56 = vld [vmem:[#allocation8 + $0x60] sm:$0xff]   ;;  %v3028_v21 = vld [vmem:[#allocation8 + $0x28] sm:$0xff]  }
 0xa85   :  { %3541 = vmatpush1.bf16.msra.mxu1 %v4003_v49  ;;  %v2293_v25 = vrot.slane %v2292_v42, 2  ;;  %v3036_v49 = vld [vmem:[#allocation8 + $0x68] sm:$0xff]  }
 0xa86   :  { %v2299_v24 = vrot.slane %v2298_v57, 2  ;;  %3543 = vmatprep.subr.bf16.mxu1 %v4004_v35  ;;  %v3037_v35 = vld [vmem:[#allocation8 + $0x70] sm:$0xff]  }
 0xa87   :  { %v2294_v36 = vadd.f32 %v2293_v25, %v2292_v42 }
 0xa88   :  { %v2300_v61 = vadd.f32 %v2299_v24, %v2298_v57  ;;  %v3029_v57 = vld [vmem:[#allocation8 + $0x30] sm:$0xff]   ;;  %v2511_v24 = vld [vmem:[%s5027_s9] sm:$0x3] }
 0xa89   :  { %3545 = vmatpush1.bf16.msra.mxu1 %v4006_v60  ;;  %v2295_v3 = vrot.slane %v2294_v36, 1  ;;  %v3030_v60 = vld [vmem:[#allocation8 + $0x38] sm:$0xff]  }
 0xa8a   :  { %v2301_v58 = vrot.slane %v2300_v61, 1  ;;  %3547 = vmatprep.subr.bf16.mxu1 %v4007_v32  ;;  %v2516_v32 = vrot.slane %v2511_v24, %v5061_v16 }
 0xa8b   :  { %v2296_v38 = vadd.f32 %v2295_v3, %v2294_v36 }
 0xa8c   :  { %v2302_v30 = vadd.f32 %v2301_v58, %v2300_v61  ;;  %v2520_v61 = vrot.slane %v2511_v24, %v4547_v33 }
 0xa8d   :  { %3549 = vmatpush1.bf16.msra.mxu1 %v4009_v54  ;;  %v2305_v51 = vmul.f32 0.125, %v2296_v38 }
 0xa8e   :  { %v2306_v4 = vmul.f32 0.125, %v2302_v30  ;;  %3551 = vmatprep.subr.bf16.mxu1 %v4010_v59 }
 0xa8f   :  { %v2309_v7 = vadd.f32 1e-05, %v2305_v51 }
 0xa90   :  { %v2310_v46 = vadd.f32 1e-05, %v2306_v4 }
 0xa91   :  { %3553 = vmatpush1.bf16.msra.mxu1 %v4012_v63 }
 0xa92   :  { %3555 = vmatprep.subr.bf16.mxu1 %v4013_v40  ;;  %4180 = vrsqrt.f32 %v2310_v46 }
 0xa93   :  { %4182 = vrsqrt.f32 %v2309_v7 }
 0xa95   :  { %3557 = vmatpush1.bf16.msra.mxu1 %v4015_v41 }
 0xa96   :  { %3559 = vmatprep.subr.bf16.mxu1 %v4016_v2 }
 0xa99   :  { %3561 = vmatpush1.bf16.msra.mxu1 %v4018_v53 }
 0xa9a   :  { %3563 = vmatprep.subr.bf16.mxu1 %v4019_v52 }
 0xa9c   :  { %v4181_v43 = vpop.eup %4180 }
 0xa9d   :  { %3565 = vmatpush1.bf16.msra.mxu1 %v4021_v26  ;;  %v2318_v1 = vmul.f32 %v4181_v43, %v2274_v55  ;;  %v4183_v14 = vpop.eup %4182  ;;  %v3025_v55 = vld [vmem:[#allocation8 + $0x10] sm:$0xff]  }
 0xa9e   :  { %3567 = vmatprep.subr.bf16.mxu1 %v4022_v29  ;;  %v2317_v15 = vmul.f32 %v4183_v14, %v4998_v44  ;;  %3609 = vmatpush3.bf16.msra.mxu0 %v3025_v55 }
 0xa9f   :  { %2658 = vmatprep.mubr.f32.mxu1 %v2318_v1  ;;  %3611 = vmatprep.subr.bf16.mxu0 %v3034_v22 }
 0xaa1   :  { %3569 = vmatpush1.bf16.msra.mxu1 %v4024_v45 }
 0xaa2   :  { %3571 = vmatprep.subr.bf16.mxu1 %v4025_v47  ;;  %3613 = vmatpush3.bf16.msra.mxu0 %v3026_v18  ;;  %v2852_v18 = vrot.slane %v2848_v6, %v5061_v16 }
 0xaa3   :  { %3615 = vmatprep.subr.bf16.mxu0 %v3035_v56 }
 0xaa5   :  { %3573 = vmatpush1.bf16.msra.mxu1 %v4027_v31 }
 0xaa6   :  { %3575 = vmatprep.subr.bf16.mxu1 %v4028_v48  ;;  %3617 = vmatpush3.bf16.msra.mxu0 %v3027_v50 }
 0xaa7   :  { %3619 = vmatprep.subr.bf16.mxu0 %v3036_v49  ;;  %v2920_v49 = vld [vmem:[#allocation2] ss:$0 sm:$0xff] }
 0xaa9   :  { %3577 = vmatpush1.bf16.msra.mxu1 %v4030_v28 }
 0xaaa   :  { %3579 = vmatprep.subr.bf16.mxu1 %v4031_v62  ;;  %3621 = vmatpush3.bf16.msra.mxu0 %v3028_v21 }
 0xaab   :  { %3623 = vmatprep.subr.bf16.mxu0 %v3037_v35 }
 0xaad   :  { %3581 = vmatpush1.bf16.msra.mxu1 %v4033_v17 }
 0xaae   :  { %3583 = vmatprep.subr.bf16.mxu1 %v4034_v39  ;;  %3625 = vmatpush3.bf16.msra.mxu0 %v3029_v57 }
 0xaaf   :  { %3627 = vmatprep.subr.bf16.mxu0 %v3038_v34 }
 0xab1   :  { %3585 = vmatpush1.bf16.msra.mxu1 %v4036_v37 }
 0xab2   :  { %3587 = vmatprep.subr.bf16.mxu1 %v4037_v8  ;;  %3629 = vmatpush3.bf16.msra.mxu0 %v3030_v60 }
 0xab5   :  { %3589 = vmatpush1.bf16.msra.mxu1 %v4039_v9 }
 0xab6   :  { %3591 = vmatprep.subr.bf16.mxu1 %v4040_v10 }
 0xab9   :  { %3593 = vmatpush1.bf16.msra.mxu1 %v4042_v11 }
 0xaba   :  { %3595 = vmatprep.subr.bf16.mxu1 %v4043_v12 }
 0xabd   :  { %3597 = vmatpush1.bf16.msra.mxu1 %v4045_v13 }
 0xac0   :  { %2659 = vmatmul.mubr.f32.vlgmr.msra.gmra.mrb[16].mxu1 %v2317_v15 }
 0xb93   :  { %v2660_v44 = vpop.f32.mrb[16].mxu1 }
 0xb94   :  { %v3630_v54 = vadd.f32 %v2660_v44, %v2516_v32  ;;  %v2662_v58 = vpop.f32.mrb[17].mxu1 }
 0xb95   :  { %v3631_v59 = vadd.f32 %v2662_v58, %v2520_v61 }
 0xb96   :  { %v2665_v30 = vmax.f32 %v3630_v54, 0.0 }
 0xb97   :  { %v2666_v27 = vmax.f32 %v3631_v59, 0.0 }
 0xb98   :  { %v2667_v63 = vrot.slane %v2665_v30, 4 }
 0xb99   :  { %v2673_v4 = vrot.slane %v2666_v27, 4 }
 0xb9a   :  { %v2668_v40 = vadd.f32 %v2667_v63, %v2665_v30 }
 0xb9b   :  { %v2674_v46 = vadd.f32 %v2673_v4, %v2666_v27 }
 0xb9c   :  { %v2669_v0 = vrot.slane %v2668_v40, 2 }
 0xb9d   :  { %v2675_v41 = vrot.slane %v2674_v46, 2 }
 0xb9e   :  { %v2670_v2 = vadd.f32 %v2669_v0, %v2668_v40 }
 0xb9f   :  { %v2676_v42 = vadd.f32 %v2675_v41, %v2674_v46 }
 0xba0   :  { %v2671_v53 = vrot.slane %v2670_v2, 1 }
 0xba1   :  { %v2677_v52 = vrot.slane %v2676_v42, 1 }
 0xba2   :  { %v2672_v25 = vadd.f32 %v2671_v53, %v2670_v2 }
 0xba3   :  { %v2678_v26 = vadd.f32 %v2677_v52, %v2676_v42 }
 0xba4   :  { %v2679_v29 = vmul.f32 0.125, %v2672_v25 }
 0xba5   :  { %v2680_v33 = vmul.f32 0.125, %v2678_v26 }
 0xba6   :  { %v2681_v43 = vsub.f32 %v2665_v30, %v2679_v29 }
 0xba7   :  { %v2682_v36 = vsub.f32 %v2666_v27, %v2680_v33 }
 0xba8   :  { %v2683_v1 = vmul.f32 %v2681_v43, %v2681_v43 }
 0xba9   :  { %v2684_v45 = vmul.f32 %v2682_v36, %v2682_v36 }
 0xbaa   :  { %v2685_v47 = vrot.slane %v2683_v1, 4 }
 0xbab   :  { %v2691_v3 = vrot.slane %v2684_v45, 4 }
 0xbac   :  { %v2686_v31 = vadd.f32 %v2685_v47, %v2683_v1 }
 0xbad   :  { %v2692_v48 = vadd.f32 %v2691_v3, %v2684_v45 }
 0xbae   :  { %v2687_v38 = vrot.slane %v2686_v31, 2 }
 0xbaf   :  { %v2693_v28 = vrot.slane %v2692_v48, 2 }
 0xbb0   :  { %v2688_v62 = vadd.f32 %v2687_v38, %v2686_v31 }
 0xbb1   :  { %v2694_v51 = vadd.f32 %v2693_v28, %v2692_v48 }
 0xbb2   :  { %v2689_v17 = vrot.slane %v2688_v62, 1 }
 0xbb3   :  { %v2695_v39 = vrot.slane %v2694_v51, 1 }
 0xbb4   :  { %v2690_v7 = vadd.f32 %v2689_v17, %v2688_v62 }
 0xbb5   :  { %v2696_v37 = vadd.f32 %v2695_v39, %v2694_v51 }
 0xbb6   :  { %v2697_v8 = vmul.f32 0.125, %v2690_v7 }
 0xbb7   :  { %v2698_v9 = vmul.f32 0.125, %v2696_v37 }
 0xbb8   :  { %v2699_v10 = vadd.f32 1e-05, %v2697_v8 }
 0xbb9   :  { %v2700_v11 = vadd.f32 1e-05, %v2698_v9 }
 0xbba   :  { %4184 = vrsqrt.f32 %v2699_v10 }
 0xbbb   :  { %4186 = vrsqrt.f32 %v2700_v11 }
 0xbc4   :  { %v4185_v12 = vpop.eup %4184 }
 0xbc5   :  { %v4187_v13 = vpop.eup %4186  ;;  %v2703_v15 = vmul.f32 %v4185_v12, %v2681_v43 }
 0xbc6   :  { %v2704_v14 = vmul.f32 %v4187_v13, %v2682_v36 }
 0xbc8   :  { %2840 = vmatprep.mubr.f32.mxu0 %v2704_v14 }
 0xbc9   :  { %2841 = vmatmul.mubr.f32.vlgmr.msra.gmra.mrb[22].mxu0 %v2703_v15 }
 0xc9c   :  { %v3088_v19 = vpop.f32.mrb[22].mxu0 }
 0xc9d   :  { %v3089_v23 = vpop.f32.mrb[23].mxu0 }
 0xc9e   :  { %v3090_v55 = vadd.f32 %v3089_v23, %v3088_v19 }
 0xca0   :  { %v2843_v22 = vadd.f32 %v3090_v55, %v2919_v20 }
 0xca2   :  { %v2846_v56 = vmax.f32 %v2843_v22, 0.0 }
 0xca4   :  { %v2853_v50 = vmul.f32 %v2852_v18, %v2846_v56 }
 0xca6   :  { %2854 = vadd.xlane.f32.xlu1 %v2853_v50 }
 0xd33   :  { %v2855_v21 = vpop.xlane.xlu1 %2854 }
 0xd34   :  { %v2863_v35 = vadd.f32 %v2920_v49, %v2855_v21 }
 0xd36   :  { %2865 = vst.msk [vmem:[%s5032_s14] sm:$0xff] %vm2864_vm2, %v2863_v35 }
 0xd37   :  { %2870 = vsyncpa [#allocation4], 1 }
 0xd38   :  { %2871 = vsyncpa [#allocation6], 1 }
 0xd39   :  { %2872 = vsyncpa [#allocation9], 1 }

</bundles_post_ra>
